<compile_context>
chip_gen: v5e
topology: v5e:2x2
jax: 0.10.0
libtpu: 0.0.40
codegen_flags: <defaults>
</compile_context>

<pallas_src>
import functools
import math

import jax
import jax.numpy as jnp
from jax.experimental import pallas as pl
from jax.experimental.pallas import tpu as pltpu

EPS = 1e-5  # nn.LayerNorm default


def _layer_norm(x, gamma, beta):
    mu = jnp.mean(x, axis=-1, keepdims=True)
    var = jnp.mean((x - mu) ** 2, axis=-1, keepdims=True)
    return (x - mu) * jax.lax.rsqrt(var + EPS) * gamma + beta


def _round_up(n, m):
    return ((n + m - 1) // m) * m


# ---------------------------------------------------------------------------
# Fused kernel: embedding -> n_layers x post-norm encoder layer -> mask -> proj
# One batch tile (Bt elements == Bt*S rows) per grid step.
# ---------------------------------------------------------------------------
def _fused_forward_kernel(nhead, n_layers, bt, seq, ffn_chunk, exact_softmax,
                          x_ref, m_ref,
                          emb_w_ref, wqkv_ref, wo_ref, w1_ref, b1_ref, w2_ref,
                          proj_w_ref, proj_b_ref, bias_ref,
                          o_ref):
    """All weight refs are pre-transposed to lane-dense (in, out) layouts, so
    every matmul is a plain `act @ w`.  MXU operands may be bf16; accumulation,
    LayerNorm and softmax stay float32."""
    D = wqkv_ref.shape[0]            # d_model
    Dh = D // nhead
    dff = w1_ref.shape[1]
    cdt = wqkv_ref.dtype             # MXU operand dtype (f32 or bf16)
    rows = bt * seq                  # M for every row-wise matmul

    x = x_ref[...]                   # (rows, enc_in)  f32
    mask = m_ref[...]                # (rows, 1)       f32

    # Packed small params: rows = [emb_b, bq, bk, bv, bo, g1, be1, b2, g2, be2]
    bias = bias_ref[...]             # (10, D) f32
    emb_b = bias[0:1]
    bq, bk, bv = bias[1:2], bias[2:3], bias[3:4]
    bo = bias[4:5]
    g1, be1 = bias[5:6], bias[6:7]
    b2 = bias[7:8]
    g2, be2 = bias[8:9], bias[9:10]

    # Embedding: (rows, enc_in) @ (enc_in, D)
    h = jnp.dot(x.astype(cdt), emb_w_ref[...],
                preferred_element_type=jnp.float32) + emb_b

    def encoder_layer(h):
        # --- fused QKV: (rows, D) @ (D, 3D); 1/sqrt(Dh) pre-folded into Q.
        qkv = jnp.dot(h.astype(cdt), wqkv_ref[...],
                      preferred_element_type=jnp.float32)
        q = (qkv[:, :D] + bq).reshape(bt, seq, D)
        k = (qkv[:, D:2 * D] + bk).reshape(bt, seq, D)
        v = (qkv[:, 2 * D:] + bv).reshape(bt, seq, D)

        # --- multi-head self-attention, batched over the batch tile.  The
        # output projection is accumulated per head against the matching
        # row block of Wo^T (folds the head concat into MXU work).
        # TODO(synk): single (bt*nhead, seq, Dh) relayout + one batched einsum
        # would drop the per-head lane slices (aligned anyway once Dh % 128 == 0).
        attn = jnp.zeros((rows, D), jnp.float32)
        for hd in range(nhead):
            lo, hi = hd * Dh, (hd + 1) * Dh
            qh = q[:, :, lo:hi].astype(cdt)
            kh = k[:, :, lo:hi].astype(cdt)
            vh = v[:, :, lo:hi].astype(cdt)
            s = jnp.einsum('bqd,bkd->bqk', qh, kh,
                           preferred_element_type=jnp.float32)   # (bt, S, S)
            s = s - jnp.max(s, axis=-1, keepdims=True)
            p = jnp.exp(s)
            denom = jnp.sum(p, axis=-1, keepdims=True)
            if exact_softmax:
                p = p / denom
            else:
                p = p * pl.reciprocal(denom, approx=True)         # EUP slot
            head = jnp.einsum('bqk,bkd->bqd', p.astype(cdt), vh,
                              preferred_element_type=jnp.float32)  # (bt, S, Dh)
            attn = attn + jnp.dot(head.reshape(rows, Dh).astype(cdt),
                                  wo_ref[lo:hi, :],
                                  preferred_element_type=jnp.float32)
        attn = attn + bo

        # Residual + LayerNorm 1 (post-norm)
        h = _layer_norm(h + attn, g1, be1)

        # --- feed-forward, tiled along dff: relu(h@W1c + b1c) @ W2c accumulated,
        # never materializing the (rows, dff) intermediate.
        h_c = h.astype(cdt)
        h2 = jnp.zeros((rows, D), jnp.float32)
        for c in range(0, dff, ffn_chunk):
            h1c = jnp.maximum(
                jnp.dot(h_c, w1_ref[:, c:c + ffn_chunk],
                        preferred_element_type=jnp.float32)
                + b1_ref[:, c:c + ffn_chunk],
                0.0)
            h2 = h2 + jnp.dot(h1c.astype(cdt), w2_ref[c:c + ffn_chunk, :],
                              preferred_element_type=jnp.float32)
        h2 = h2 + b2

        # Residual + LayerNorm 2
        return _layer_norm(h + h2, g2, be2)

    # encoder_layer + 2 deep-copied layers (shared weights) => n_layers apps.
    h = jax.lax.fori_loop(0, n_layers, lambda _, hh: encoder_layer(hh), h)

    # output = h * mask; output_bd = projection(output) into a lane-dense
    # (rows, enc_in_padded_to_128) slab.
    h = (h * mask).astype(cdt)
    out = jnp.dot(h, proj_w_ref[...],
                  preferred_element_type=jnp.float32) + proj_b_ref[...]
    o_ref[...] = out.astype(o_ref.dtype)


# ---------------------------------------------------------------------------
# pallas_call wrapper
# ---------------------------------------------------------------------------
_WEIGHT_ORDER = ("emb_w", "wqkv", "wo", "w1", "b1", "w2",
                 "proj_w", "proj_b", "bias_pack")


def _replicated_spec(shape):
    nd = len(shape)
    # Constant index_map => the block never changes across grid steps; single
    # buffering halves the weights' VMEM footprint (no re-DMA needed anyway).
    return pl.BlockSpec(shape, lambda i: (0,) * nd,
                        pipeline_mode=pl.Buffered(1))


def _choose_batch_tile(B, S, target_rows=256):
    """Batch tile Bt: drive rows-per-step (Bt*S) toward the MXU sweet spot, but
    keep >= 2 grid steps when B permits so v7x's two TensorCores both work."""
    want = max(1, target_rows // max(S, 1))
    bt = 1
    for d in range(1, B + 1):
        if B % d == 0 and d <= want:
            bt = d
    if B // bt < 2 and B >= 2:
        for d in range(B // 2, 0, -1):
            if B % d == 0:
                bt = d
                break
    return bt


def _default_vmem_limit_bytes():
    try:
        kind = jax.devices()[0].device_kind.lower()
    except Exception:
        kind = ""
    if "v5" in kind or "v6" in kind:
        return 100 * 1024 * 1024   # 128 MiB physical VMEM -> generous limit
    if "v7" in kind:
        return 48 * 1024 * 1024    # 64 MiB physical on v7x -> leave headroom
    return 32 * 1024 * 1024        # conservative default for unknown parts


def prepare_kernel_params(params, nhead, enc_in_pad, compute_dtype=jnp.float32):
    """Pre-transpose PyTorch-layout (out, in) weights to lane-dense (in, out)
    kernel layouts, fold the 1/sqrt(Dh) attention scale into the Q projection,
    pad the projection to a lane-dense output width, and pack the small
    bias / LayerNorm vectors into one (10, d_model) array.  MXU operands may be
    cast to bf16; everything feeding f32 accumulators stays float32."""
    L = params["layer"]
    cd, f32 = compute_dtype, jnp.float32
    d_model, enc_in = params["emb_w"].shape
    dh = d_model // nhead
    scale = 1.0 / math.sqrt(dh)

    # Fused QKV weight, columns ordered [Q | K | V]; scale folded into Q.
    wqkv_t = L["wqkv"].T                                   # (d_model, 3*d_model)
    wqkv_t = jnp.concatenate([wqkv_t[:, :d_model] * scale,
                              wqkv_t[:, d_model:]], axis=1)
    bqkv_rows = L["bqkv"].reshape(3, d_model)              # rows [bq, bk, bv]
    bqkv_rows = jnp.concatenate([bqkv_rows[:1] * scale, bqkv_rows[1:]], axis=0)

    # Lane-dense padded projection (extra columns are zero; sliced off outside).
    proj_w_t = params["proj_w"].T                          # (d_model, enc_in)
    proj_w_pad = jnp.zeros((d_model, enc_in_pad), f32).at[:, :enc_in].set(proj_w_t)
    proj_b_pad = jnp.zeros((1, enc_in_pad), f32).at[:, :enc_in].set(params["proj_b"])

    bias_pack = jnp.concatenate(
        [params["emb_b"], bqkv_rows, L["bo"], L["g1"], L["be1"],
         L["b2"], L["g2"], L["be2"]], axis=0).astype(f32)  # (10, d_model)

    return {
        "emb_w": params["emb_w"].T.astype(cd),   # (enc_in, d_model)
        "wqkv": wqkv_t.astype(cd),               # (d_model, 3*d_model)
        "wo": L["wo"].T.astype(cd),              # (d_model, d_model)
        "w1": L["w1"].T.astype(cd),              # (d_model, dff)   lane-dense
        "b1": L["b1"].astype(f32),               # (1, dff)
        "w2": L["w2"].T.astype(cd),              # (dff, d_model)
        "proj_w": proj_w_pad.astype(cd),         # (d_model, enc_in_pad)
        "proj_b": proj_b_pad,                    # (1, enc_in_pad)  f32
        "bias_pack": bias_pack,                  # (10, d_model)    f32
    }


def bd_transformer_forward(params, x, x_mark_enc, *, nhead=4, n_layers=3,
                           compute_dtype=jnp.float32, exact_softmax=False,
                           batch_tile=None, ffn_chunk=512,
                           vmem_limit_bytes=None):
    x = x.astype(jnp.float32)
    B, S, E = x.shape
    dff = params["layer"]["w1"].shape[0]
    e_pad = _round_up(E, 128)

    bt = batch_tile if batch_tile is not None else _choose_batch_tile(B, S)
    if B % bt != 0:
        bt = B
    if (bt * S) % 8 != 0 and bt != B:     # keep the row-block sublane-aligned
        bt = B
    nsteps = B // bt
    rows = bt * S

    if ffn_chunk is None or ffn_chunk <= 0 or dff % ffn_chunk != 0:
        ffn_chunk = dff
    fc = min(ffn_chunk, dff)

    if vmem_limit_bytes is None:
        vmem_limit_bytes = _default_vmem_limit_bytes()

    kp = prepare_kernel_params(params, nhead, e_pad, compute_dtype)
    weights = tuple(kp[name] for name in _WEIGHT_ORDER)

    # Flatten to row slabs: all row-wise matmuls see M = bt*S rows per step.
    x2 = x.reshape(B * S, E)
    mask2 = x_mark_enc.astype(jnp.float32).reshape(B * S, 1)

    kernel = functools.partial(_fused_forward_kernel, nhead, n_layers, bt, S,
                               fc, exact_softmax)

    in_specs = ([pl.BlockSpec((rows, E), lambda i: (i, 0)),
                 pl.BlockSpec((rows, 1), lambda i: (i, 0))]
                + [_replicated_spec(w.shape) for w in weights])

    out_pad = pl.pallas_call(
        kernel,
        out_shape=jax.ShapeDtypeStruct((B * S, e_pad), jnp.float32),
        grid=(nsteps,),
        in_specs=in_specs,
        out_specs=pl.BlockSpec((rows, e_pad), lambda i: (i, 0)),
        compiler_params=pltpu.CompilerParams(
            dimension_semantics=("parallel",),
            vmem_limit_bytes=vmem_limit_bytes),
    )(x2, mask2, *weights)

    output_bd = out_pad[:, :E].reshape(B, S, E)

    # batch-concat of original input and boundary output, duplicate the mark
    x_new = jnp.concatenate([x, output_bd], axis=0)
    x_mark_cat = jnp.concatenate([x_mark_enc, x_mark_enc], axis=0)
    # TODO(synk): `vanilla_model` is an externally injected nn.Module; its preds
    # are not computed here — we return the tensors that would be fed to it.
    return output_bd, (x_new, x_mark_cat)


# ---------------------------------------------------------------------------
# Parameters (PyTorch (out, in) layouts; deterministic synthetic init)
# ---------------------------------------------------------------------------
def init_params(key, enc_in, d_model, dff=2048):
    ks = jax.random.split(key, 12)

    def w(k, shape, scale=0.02):
        return jax.random.normal(k, shape, jnp.float32) * scale

    return {
        # nn.Linear(enc_in, d_model)
        "emb_w": w(ks[0], (d_model, enc_in)),
        "emb_b": w(ks[1], (1, d_model), 0.01),
        # nn.Linear(d_model, enc_in)
        "proj_w": w(ks[2], (enc_in, d_model)),
        "proj_b": w(ks[3], (1, enc_in), 0.01),
        # nn.TransformerEncoderLayer(d_model, nhead=4).  The 2 layers inside
        # nn.TransformerEncoder are deep copies of this (untrained) layer, so
        # one weight set is shared by all 3 applications in forward().
        "layer": {
            "wqkv": w(ks[4], (3 * d_model, d_model)),
            "bqkv": w(ks[5], (1, 3 * d_model), 0.01),
            "wo": w(ks[6], (d_model, d_model)),
            "bo": w(ks[7], (1, d_model), 0.01),
            "g1": jnp.ones((1, d_model), jnp.float32),
            "be1": jnp.zeros((1, d_model), jnp.float32),
            "w1": w(ks[8], (dff, d_model)),       # linear1: d_model -> dff
            "b1": w(ks[9], (1, dff), 0.01),
            "w2": w(ks[10], (d_model, dff)),      # linear2: dff -> d_model
            "b2": w(ks[11], (1, d_model), 0.01),
            "g2": jnp.ones((1, d_model), jnp.float32),
            "be2": jnp.zeros((1, d_model), jnp.float32),
        },
    }


# ---------------------------------------------------------------------------
# Pure-JAX reference (PyTorch semantics) for a correctness cross-check
# ---------------------------------------------------------------------------
def reference_forward(params, x, x_mark_enc, nhead=4, n_layers=3):
    L = params["layer"]
    D = params["emb_w"].shape[0]
    Dh = D // nhead
    h = x @ params["emb_w"].T + params["emb_b"]
    for _ in range(n_layers):
        qkv = h @ L["wqkv"].T + L["bqkv"]
        q, k, v = qkv[..., :D], qkv[..., D:2 * D], qkv[..., 2 * D:]
        heads = []
        for hd in range(nhead):
            sl = slice(hd * Dh, (hd + 1) * Dh)
            s = (q[..., sl] / math.sqrt(Dh)) @ jnp.swapaxes(k[..., sl], -1, -2)
            p = jax.nn.softmax(s, axis=-1)
            heads.append(p @ v[..., sl])
        attn = jnp.concatenate(heads, axis=-1) @ L["wo"].T + L["bo"]
        h = _layer_norm(h + attn, L["g1"], L["be1"])
        h1 = jax.nn.relu(h @ L["w1"].T + L["b1"])
        h2 = h1 @ L["w2"].T + L["b2"]
        h = _layer_norm(h + h2, L["g2"], L["be2"])
    return (h * x_mark_enc[..., None]) @ params["proj_w"].T + params["proj_b"]


# ---------------------------------------------------------------------------
# Demo
# ---------------------------------------------------------------------------
if __name__ == "__main__":
    B, S, ENC_IN, D_MODEL, DFF = 2, 8, 4, 32, 2048  # dff stays at PyTorch default
    NHEAD, NLAYERS = 4, 3

    key = jax.random.PRNGKey(0)
    kx, km, kp = jax.random.split(key, 3)
    x = jax.random.normal(kx, (B, S, ENC_IN), jnp.float32)
    x_mark_enc = jax.random.normal(km, (B, S), jnp.float32)

    params = init_params(kp, ENC_IN, D_MODEL, dff=DFF)

    # f32 + exact softmax reciprocal validation run vs. the pure-JAX reference.
    out_f32, (x_new, x_mark_cat) = bd_transformer_forward(
        params, x, x_mark_enc, nhead=NHEAD, n_layers=NLAYERS,
        compute_dtype=jnp.float32, exact_softmax=True)
    jax.block_until_ready((out_f32, x_new, x_mark_cat))

    ref = reference_forward(params, x, x_mark_enc, nhead=NHEAD, n_layers=NLAYERS)
    err = float(jnp.max(jnp.abs(out_f32 - ref)))
    assert err < 2e-2, f"kernel/reference mismatch: max abs err {err}"

    assert out_f32.shape == (B, S, ENC_IN)
    assert x_new.shape == (2 * B, S, ENC_IN)
    assert x_mark_cat.shape == (2 * B, S)

    # Fast path: bf16 MXU operands + approx softmax reciprocal (f32 accum).
    out_fast, _ = bd_transformer_forward(
        params, x, x_mark_enc, nhead=NHEAD, n_layers=NLAYERS,
        compute_dtype=jnp.bfloat16, exact_softmax=False)
    jax.block_until_ready(out_fast)
    assert bool(jnp.all(jnp.isfinite(out_fast)))
    err_fast = float(jnp.max(jnp.abs(out_fast - ref)))
    assert err_fast < 1e-1, f"bf16 fast path drifted: max abs err {err_fast}"

    print("KERNEL_OK")
</pallas_src>

<mosaic_0001>
module attributes {stable_mosaic.version = 11 : i64} {
  func.func @_fused_forward_kernel(%arg0: i32, %arg1: memref<8x4xf32, #tpu.memory_space<vmem>>, %arg2: memref<8x1xf32, #tpu.memory_space<vmem>>, %arg3: memref<4x32xf32, #tpu.memory_space<vmem>>, %arg4: memref<32x96xf32, #tpu.memory_space<vmem>>, %arg5: memref<32x32xf32, #tpu.memory_space<vmem>>, %arg6: memref<32x2048xf32, #tpu.memory_space<vmem>>, %arg7: memref<1x2048xf32, #tpu.memory_space<vmem>>, %arg8: memref<2048x32xf32, #tpu.memory_space<vmem>>, %arg9: memref<32x128xf32, #tpu.memory_space<vmem>>, %arg10: memref<1x128xf32, #tpu.memory_space<vmem>>, %arg11: memref<10x32xf32, #tpu.memory_space<vmem>>, %arg12: memref<8x128xf32, #tpu.memory_space<vmem>>) attributes {dimension_semantics = [#tpu.dimension_semantics<parallel>], iteration_bounds = array<i64: 2>, scalar_prefetch = 0 : i64, scratch_operands = 0 : i64, tpu.core_type = #tpu.core_type<tc>, window_params = [{transform_indices = @transform_0, window_bounds = array<i64: 8, 4>}, {transform_indices = @transform_1, window_bounds = array<i64: 8, 1>}, {pipeline_mode = #tpu.pipeline_mode<synchronous>, transform_indices = @transform_2, window_bounds = array<i64: 4, 32>}, {pipeline_mode = #tpu.pipeline_mode<synchronous>, transform_indices = @transform_3, window_bounds = array<i64: 32, 96>}, {pipeline_mode = #tpu.pipeline_mode<synchronous>, transform_indices = @transform_4, window_bounds = array<i64: 32, 32>}, {pipeline_mode = #tpu.pipeline_mode<synchronous>, transform_indices = @transform_5, window_bounds = array<i64: 32, 2048>}, {pipeline_mode = #tpu.pipeline_mode<synchronous>, transform_indices = @transform_6, window_bounds = array<i64: 1, 2048>}, {pipeline_mode = #tpu.pipeline_mode<synchronous>, transform_indices = @transform_7, window_bounds = array<i64: 2048, 32>}, {pipeline_mode = #tpu.pipeline_mode<synchronous>, transform_indices = @transform_8, window_bounds = array<i64: 32, 128>}, {pipeline_mode = #tpu.pipeline_mode<synchronous>, transform_indices = @transform_9, window_bounds = array<i64: 1, 128>}, {pipeline_mode = #tpu.pipeline_mode<synchronous>, transform_indices = @transform_10, window_bounds = array<i64: 10, 32>}, {transform_indices = @transform_11, window_bounds = array<i64: 8, 128>}]} {
    %c0 = arith.constant 0 : index
    %c0_0 = arith.constant 0 : index
    %0 = vector.load %arg1[%c0, %c0_0] : memref<8x4xf32, #tpu.memory_space<vmem>>, vector<8x4xf32>
    %c0_1 = arith.constant 0 : index
    %c0_2 = arith.constant 0 : index
    %1 = vector.load %arg2[%c0_1, %c0_2] : memref<8x1xf32, #tpu.memory_space<vmem>>, vector<8x1xf32>
    %c0_3 = arith.constant 0 : index
    %c0_4 = arith.constant 0 : index
    %2 = vector.load %arg11[%c0_3, %c0_4] : memref<10x32xf32, #tpu.memory_space<vmem>>, vector<10x32xf32>
    %3 = vector.extract_strided_slice %2 {offsets = [0, 0], sizes = [1, 32], strides = [1, 1]} : vector<10x32xf32> to vector<1x32xf32>
    %4 = vector.extract_strided_slice %2 {offsets = [1, 0], sizes = [1, 32], strides = [1, 1]} : vector<10x32xf32> to vector<1x32xf32>
    %5 = vector.extract_strided_slice %2 {offsets = [2, 0], sizes = [1, 32], strides = [1, 1]} : vector<10x32xf32> to vector<1x32xf32>
    %6 = vector.extract_strided_slice %2 {offsets = [3, 0], sizes = [1, 32], strides = [1, 1]} : vector<10x32xf32> to vector<1x32xf32>
    %7 = vector.extract_strided_slice %2 {offsets = [4, 0], sizes = [1, 32], strides = [1, 1]} : vector<10x32xf32> to vector<1x32xf32>
    %8 = vector.extract_strided_slice %2 {offsets = [5, 0], sizes = [1, 32], strides = [1, 1]} : vector<10x32xf32> to vector<1x32xf32>
    %9 = vector.extract_strided_slice %2 {offsets = [6, 0], sizes = [1, 32], strides = [1, 1]} : vector<10x32xf32> to vector<1x32xf32>
    %10 = vector.extract_strided_slice %2 {offsets = [7, 0], sizes = [1, 32], strides = [1, 1]} : vector<10x32xf32> to vector<1x32xf32>
    %11 = vector.extract_strided_slice %2 {offsets = [8, 0], sizes = [1, 32], strides = [1, 1]} : vector<10x32xf32> to vector<1x32xf32>
    %12 = vector.extract_strided_slice %2 {offsets = [9, 0], sizes = [1, 32], strides = [1, 1]} : vector<10x32xf32> to vector<1x32xf32>
    %c0_5 = arith.constant 0 : index
    %c0_6 = arith.constant 0 : index
    %13 = vector.load %arg3[%c0_5, %c0_6] : memref<4x32xf32, #tpu.memory_space<vmem>>, vector<4x32xf32>
    %cst = arith.constant dense<0.000000e+00> : vector<8x32xf32>
    %14 = tpu.matmul %0, %13, %cst {dimension_numbers = #tpu.dot_dimension_numbers<[1], [0], [0], [1], [0, 0, 1, 1], [], []>} : vector<8x4xf32>, vector<4x32xf32>, vector<8x32xf32> -> vector<8x32xf32>
    %15 = vector.broadcast %3 : vector<1x32xf32> to vector<8x32xf32>
    %16 = arith.addf %14, %15 : vector<8x32xf32>
    %c0_i32 = arith.constant 0 : i32
    %c3_i32 = arith.constant 3 : i32
    %17 = arith.addi %c0_i32, %c3_i32 : i32
    %c1_i32 = arith.constant 1 : i32
    %18 = scf.for %arg13 = %c0_i32 to %17 step %c1_i32 iter_args(%arg14 = %16) -> (vector<8x32xf32>)  : i32 {
      %c0_14 = arith.constant 0 : index
      %c0_15 = arith.constant 0 : index
      %27 = vector.load %arg4[%c0_14, %c0_15] : memref<32x96xf32, #tpu.memory_space<vmem>>, vector<32x96xf32>
      %cst_16 = arith.constant dense<0.000000e+00> : vector<8x96xf32>
      %28 = tpu.matmul %arg14, %27, %cst_16 {dimension_numbers = #tpu.dot_dimension_numbers<[1], [0], [0], [1], [0, 0, 1, 1], [], []>} : vector<8x32xf32>, vector<32x96xf32>, vector<8x96xf32> -> vector<8x96xf32>
      %29 = vector.extract_strided_slice %28 {offsets = [0, 0], sizes = [8, 32], strides = [1, 1]} : vector<8x96xf32> to vector<8x32xf32>
      %30 = vector.broadcast %4 : vector<1x32xf32> to vector<8x32xf32>
      %31 = arith.addf %29, %30 : vector<8x32xf32>
      %32 = vector.shape_cast %31 : vector<8x32xf32> to vector<1x8x32xf32>
      %33 = vector.extract_strided_slice %28 {offsets = [0, 32], sizes = [8, 32], strides = [1, 1]} : vector<8x96xf32> to vector<8x32xf32>
      %34 = vector.broadcast %5 : vector<1x32xf32> to vector<8x32xf32>
      %35 = arith.addf %33, %34 : vector<8x32xf32>
      %36 = vector.shape_cast %35 : vector<8x32xf32> to vector<1x8x32xf32>
      %37 = vector.extract_strided_slice %28 {offsets = [0, 64], sizes = [8, 32], strides = [1, 1]} : vector<8x96xf32> to vector<8x32xf32>
      %38 = vector.broadcast %6 : vector<1x32xf32> to vector<8x32xf32>
      %39 = arith.addf %37, %38 : vector<8x32xf32>
      %40 = vector.shape_cast %39 : vector<8x32xf32> to vector<1x8x32xf32>
      %cst_17 = arith.constant 0.000000e+00 : f32
      %41 = vector.broadcast %cst_17 : f32 to vector<8x32xf32>
      %42 = vector.extract_strided_slice %32 {offsets = [0, 0, 0], sizes = [1, 8, 8], strides = [1, 1, 1]} : vector<1x8x32xf32> to vector<1x8x8xf32>
      %43 = vector.extract_strided_slice %36 {offsets = [0, 0, 0], sizes = [1, 8, 8], strides = [1, 1, 1]} : vector<1x8x32xf32> to vector<1x8x8xf32>
      %44 = vector.extract_strided_slice %40 {offsets = [0, 0, 0], sizes = [1, 8, 8], strides = [1, 1, 1]} : vector<1x8x32xf32> to vector<1x8x8xf32>
      "tpu.trace_start"() <{level = 10 : i32, message = "bqd,bkd->bqk"}> : () -> ()
      %cst_18 = arith.constant dense<0.000000e+00> : vector<1x8x8xf32>
      %45 = tpu.matmul %42, %43, %cst_18 {dimension_numbers = #tpu.dot_dimension_numbers<[2], [2], [1], [1], [0, 0, 0, 1, 1, 1], [0], [0]>} : vector<1x8x8xf32>, vector<1x8x8xf32>, vector<1x8x8xf32> -> vector<1x8x8xf32>
      "tpu.trace_stop"() : () -> ()
      %cst_19 = arith.constant dense<0xFF800000> : vector<1x8xf32>
      %46 = vector.multi_reduction <maximumf>, %45, %cst_19 [2] : vector<1x8x8xf32> to vector<1x8xf32>
      %47 = vector.shape_cast %46 : vector<1x8xf32> to vector<1x8x1xf32>
      %48 = vector.broadcast %47 : vector<1x8x1xf32> to vector<1x8x8xf32>
      %49 = arith.subf %45, %48 : vector<1x8x8xf32>
      %50 = math.exp %49 : vector<1x8x8xf32>
      %cst_20 = arith.constant dense<0.000000e+00> : vector<1x8xf32>
      %51 = vector.multi_reduction <add>, %50, %cst_20 [2] : vector<1x8x8xf32> to vector<1x8xf32>
      %52 = vector.shape_cast %51 : vector<1x8xf32> to vector<1x8x1xf32>
      %53 = vector.broadcast %52 : vector<1x8x1xf32> to vector<1x8x8xf32>
      %54 = arith.divf %50, %53 : vector<1x8x8xf32>
      "tpu.trace_start"() <{level = 10 : i32, message = "bqk,bkd->bqd"}> : () -> ()
      %cst_21 = arith.constant dense<0.000000e+00> : vector<1x8x8xf32>
      %55 = tpu.matmul %54, %44, %cst_21 {dimension_numbers = #tpu.dot_dimension_numbers<[2], [1], [1], [2], [0, 0, 0, 1, 1, 2], [0], [0]>} : vector<1x8x8xf32>, vector<1x8x8xf32>, vector<1x8x8xf32> -> vector<1x8x8xf32>
      "tpu.trace_stop"() : () -> ()
      %56 = vector.shape_cast %55 : vector<1x8x8xf32> to vector<8x8xf32>
      %c0_22 = arith.constant 0 : index
      %c0_23 = arith.constant 0 : index
      %57 = vector.load %arg5[%c0_22, %c0_23] : memref<32x32xf32, #tpu.memory_space<vmem>>, vector<8x32xf32>
      %cst_24 = arith.constant dense<0.000000e+00> : vector<8x32xf32>
      %58 = tpu.matmul %56, %57, %cst_24 {dimension_numbers = #tpu.dot_dimension_numbers<[1], [0], [0], [1], [0, 0, 1, 1], [], []>} : vector<8x8xf32>, vector<8x32xf32>, vector<8x32xf32> -> vector<8x32xf32>
      %59 = arith.addf %41, %58 : vector<8x32xf32>
      %60 = vector.extract_strided_slice %32 {offsets = [0, 0, 8], sizes = [1, 8, 8], strides = [1, 1, 1]} : vector<1x8x32xf32> to vector<1x8x8xf32>
      %61 = vector.extract_strided_slice %36 {offsets = [0, 0, 8], sizes = [1, 8, 8], strides = [1, 1, 1]} : vector<1x8x32xf32> to vector<1x8x8xf32>
      %62 = vector.extract_strided_slice %40 {offsets = [0, 0, 8], sizes = [1, 8, 8], strides = [1, 1, 1]} : vector<1x8x32xf32> to vector<1x8x8xf32>
      "tpu.trace_start"() <{level = 10 : i32, message = "bqd,bkd->bqk"}> : () -> ()
      %cst_25 = arith.constant dense<0.000000e+00> : vector<1x8x8xf32>
      %63 = tpu.matmul %60, %61, %cst_25 {dimension_numbers = #tpu.dot_dimension_numbers<[2], [2], [1], [1], [0, 0, 0, 1, 1, 1], [0], [0]>} : vector<1x8x8xf32>, vector<1x8x8xf32>, vector<1x8x8xf32> -> vector<1x8x8xf32>
      "tpu.trace_stop"() : () -> ()
      %cst_26 = arith.constant dense<0xFF800000> : vector<1x8xf32>
      %64 = vector.multi_reduction <maximumf>, %63, %cst_26 [2] : vector<1x8x8xf32> to vector<1x8xf32>
      %65 = vector.shape_cast %64 : vector<1x8xf32> to vector<1x8x1xf32>
      %66 = vector.broadcast %65 : vector<1x8x1xf32> to vector<1x8x8xf32>
      %67 = arith.subf %63, %66 : vector<1x8x8xf32>
      %68 = math.exp %67 : vector<1x8x8xf32>
      %cst_27 = arith.constant dense<0.000000e+00> : vector<1x8xf32>
      %69 = vector.multi_reduction <add>, %68, %cst_27 [2] : vector<1x8x8xf32> to vector<1x8xf32>
      %70 = vector.shape_cast %69 : vector<1x8xf32> to vector<1x8x1xf32>
      %71 = vector.broadcast %70 : vector<1x8x1xf32> to vector<1x8x8xf32>
      %72 = arith.divf %68, %71 : vector<1x8x8xf32>
      "tpu.trace_start"() <{level = 10 : i32, message = "bqk,bkd->bqd"}> : () -> ()
      %cst_28 = arith.constant dense<0.000000e+00> : vector<1x8x8xf32>
      %73 = tpu.matmul %72, %62, %cst_28 {dimension_numbers = #tpu.dot_dimension_numbers<[2], [1], [1], [2], [0, 0, 0, 1, 1, 2], [0], [0]>} : vector<1x8x8xf32>, vector<1x8x8xf32>, vector<1x8x8xf32> -> vector<1x8x8xf32>
      "tpu.trace_stop"() : () -> ()
      %74 = vector.shape_cast %73 : vector<1x8x8xf32> to vector<8x8xf32>
      %c8 = arith.constant 8 : index
      %c0_29 = arith.constant 0 : index
      %75 = vector.load %arg5[%c8, %c0_29] : memref<32x32xf32, #tpu.memory_space<vmem>>, vector<8x32xf32>
      %cst_30 = arith.constant dense<0.000000e+00> : vector<8x32xf32>
      %76 = tpu.matmul %74, %75, %cst_30 {dimension_numbers = #tpu.dot_dimension_numbers<[1], [0], [0], [1], [0, 0, 1, 1], [], []>} : vector<8x8xf32>, vector<8x32xf32>, vector<8x32xf32> -> vector<8x32xf32>
      %77 = arith.addf %59, %76 : vector<8x32xf32>
      %78 = vector.extract_strided_slice %32 {offsets = [0, 0, 16], sizes = [1, 8, 8], strides = [1, 1, 1]} : vector<1x8x32xf32> to vector<1x8x8xf32>
      %79 = vector.extract_strided_slice %36 {offsets = [0, 0, 16], sizes = [1, 8, 8], strides = [1, 1, 1]} : vector<1x8x32xf32> to vector<1x8x8xf32>
      %80 = vector.extract_strided_slice %40 {offsets = [0, 0, 16], sizes = [1, 8, 8], strides = [1, 1, 1]} : vector<1x8x32xf32> to vector<1x8x8xf32>
      "tpu.trace_start"() <{level = 10 : i32, message = "bqd,bkd->bqk"}> : () -> ()
      %cst_31 = arith.constant dense<0.000000e+00> : vector<1x8x8xf32>
      %81 = tpu.matmul %78, %79, %cst_31 {dimension_numbers = #tpu.dot_dimension_numbers<[2], [2], [1], [1], [0, 0, 0, 1, 1, 1], [0], [0]>} : vector<1x8x8xf32>, vector<1x8x8xf32>, vector<1x8x8xf32> -> vector<1x8x8xf32>
      "tpu.trace_stop"() : () -> ()
      %cst_32 = arith.constant dense<0xFF800000> : vector<1x8xf32>
      %82 = vector.multi_reduction <maximumf>, %81, %cst_32 [2] : vector<1x8x8xf32> to vector<1x8xf32>
      %83 = vector.shape_cast %82 : vector<1x8xf32> to vector<1x8x1xf32>
      %84 = vector.broadcast %83 : vector<1x8x1xf32> to vector<1x8x8xf32>
      %85 = arith.subf %81, %84 : vector<1x8x8xf32>
      %86 = math.exp %85 : vector<1x8x8xf32>
      %cst_33 = arith.constant dense<0.000000e+00> : vector<1x8xf32>
      %87 = vector.multi_reduction <add>, %86, %cst_33 [2] : vector<1x8x8xf32> to vector<1x8xf32>
      %88 = vector.shape_cast %87 : vector<1x8xf32> to vector<1x8x1xf32>
      %89 = vector.broadcast %88 : vector<1x8x1xf32> to vector<1x8x8xf32>
      %90 = arith.divf %86, %89 : vector<1x8x8xf32>
      "tpu.trace_start"() <{level = 10 : i32, message = "bqk,bkd->bqd"}> : () -> ()
      %cst_34 = arith.constant dense<0.000000e+00> : vector<1x8x8xf32>
      %91 = tpu.matmul %90, %80, %cst_34 {dimension_numbers = #tpu.dot_dimension_numbers<[2], [1], [1], [2], [0, 0, 0, 1, 1, 2], [0], [0]>} : vector<1x8x8xf32>, vector<1x8x8xf32>, vector<1x8x8xf32> -> vector<1x8x8xf32>
      "tpu.trace_stop"() : () -> ()
      %92 = vector.shape_cast %91 : vector<1x8x8xf32> to vector<8x8xf32>
      %c16 = arith.constant 16 : index
      %c0_35 = arith.constant 0 : index
      %93 = vector.load %arg5[%c16, %c0_35] : memref<32x32xf32, #tpu.memory_space<vmem>>, vector<8x32xf32>
      %cst_36 = arith.constant dense<0.000000e+00> : vector<8x32xf32>
      %94 = tpu.matmul %92, %93, %cst_36 {dimension_numbers = #tpu.dot_dimension_numbers<[1], [0], [0], [1], [0, 0, 1, 1], [], []>} : vector<8x8xf32>, vector<8x32xf32>, vector<8x32xf32> -> vector<8x32xf32>
      %95 = arith.addf %77, %94 : vector<8x32xf32>
      %96 = vector.extract_strided_slice %32 {offsets = [0, 0, 24], sizes = [1, 8, 8], strides = [1, 1, 1]} : vector<1x8x32xf32> to vector<1x8x8xf32>
      %97 = vector.extract_strided_slice %36 {offsets = [0, 0, 24], sizes = [1, 8, 8], strides = [1, 1, 1]} : vector<1x8x32xf32> to vector<1x8x8xf32>
      %98 = vector.extract_strided_slice %40 {offsets = [0, 0, 24], sizes = [1, 8, 8], strides = [1, 1, 1]} : vector<1x8x32xf32> to vector<1x8x8xf32>
      "tpu.trace_start"() <{level = 10 : i32, message = "bqd,bkd->bqk"}> : () -> ()
      %cst_37 = arith.constant dense<0.000000e+00> : vector<1x8x8xf32>
      %99 = tpu.matmul %96, %97, %cst_37 {dimension_numbers = #tpu.dot_dimension_numbers<[2], [2], [1], [1], [0, 0, 0, 1, 1, 1], [0], [0]>} : vector<1x8x8xf32>, vector<1x8x8xf32>, vector<1x8x8xf32> -> vector<1x8x8xf32>
      "tpu.trace_stop"() : () -> ()
      %cst_38 = arith.constant dense<0xFF800000> : vector<1x8xf32>
      %100 = vector.multi_reduction <maximumf>, %99, %cst_38 [2] : vector<1x8x8xf32> to vector<1x8xf32>
      %101 = vector.shape_cast %100 : vector<1x8xf32> to vector<1x8x1xf32>
      %102 = vector.broadcast %101 : vector<1x8x1xf32> to vector<1x8x8xf32>
      %103 = arith.subf %99, %102 : vector<1x8x8xf32>
      %104 = math.exp %103 : vector<1x8x8xf32>
      %cst_39 = arith.constant dense<0.000000e+00> : vector<1x8xf32>
      %105 = vector.multi_reduction <add>, %104, %cst_39 [2] : vector<1x8x8xf32> to vector<1x8xf32>
      %106 = vector.shape_cast %105 : vector<1x8xf32> to vector<1x8x1xf32>
      %107 = vector.broadcast %106 : vector<1x8x1xf32> to vector<1x8x8xf32>
      %108 = arith.divf %104, %107 : vector<1x8x8xf32>
      "tpu.trace_start"() <{level = 10 : i32, message = "bqk,bkd->bqd"}> : () -> ()
      %cst_40 = arith.constant dense<0.000000e+00> : vector<1x8x8xf32>
      %109 = tpu.matmul %108, %98, %cst_40 {dimension_numbers = #tpu.dot_dimension_numbers<[2], [1], [1], [2], [0, 0, 0, 1, 1, 2], [0], [0]>} : vector<1x8x8xf32>, vector<1x8x8xf32>, vector<1x8x8xf32> -> vector<1x8x8xf32>
      "tpu.trace_stop"() : () -> ()
      %110 = vector.shape_cast %109 : vector<1x8x8xf32> to vector<8x8xf32>
      %c24 = arith.constant 24 : index
      %c0_41 = arith.constant 0 : index
      %111 = vector.load %arg5[%c24, %c0_41] : memref<32x32xf32, #tpu.memory_space<vmem>>, vector<8x32xf32>
      %cst_42 = arith.constant dense<0.000000e+00> : vector<8x32xf32>
      %112 = tpu.matmul %110, %111, %cst_42 {dimension_numbers = #tpu.dot_dimension_numbers<[1], [0], [0], [1], [0, 0, 1, 1], [], []>} : vector<8x8xf32>, vector<8x32xf32>, vector<8x32xf32> -> vector<8x32xf32>
      %113 = arith.addf %95, %112 : vector<8x32xf32>
      %114 = vector.broadcast %7 : vector<1x32xf32> to vector<8x32xf32>
      %115 = arith.addf %113, %114 : vector<8x32xf32>
      %116 = arith.addf %arg14, %115 : vector<8x32xf32>
      %cst_43 = arith.constant dense<0.000000e+00> : vector<8xf32>
      %117 = vector.multi_reduction <add>, %116, %cst_43 [1] : vector<8x32xf32> to vector<8xf32>
      %118 = vector.shape_cast %117 : vector<8xf32> to vector<8x1xf32>
      %cst_44 = arith.constant 3.200000e+01 : f32
      %119 = vector.broadcast %cst_44 : f32 to vector<8x1xf32>
      %120 = arith.divf %118, %119 : vector<8x1xf32>
      %121 = vector.broadcast %120 : vector<8x1xf32> to vector<8x32xf32>
      %122 = arith.subf %116, %121 : vector<8x32xf32>
      %123 = arith.mulf %122, %122 : vector<8x32xf32>
      %cst_45 = arith.constant dense<0.000000e+00> : vector<8xf32>
      %124 = vector.multi_reduction <add>, %123, %cst_45 [1] : vector<8x32xf32> to vector<8xf32>
      %125 = vector.shape_cast %124 : vector<8xf32> to vector<8x1xf32>
      %cst_46 = arith.constant 3.200000e+01 : f32
      %126 = vector.broadcast %cst_46 : f32 to vector<8x1xf32>
      %127 = arith.divf %125, %126 : vector<8x1xf32>
      %128 = vector.broadcast %120 : vector<8x1xf32> to vector<8x32xf32>
      %129 = arith.subf %116, %128 : vector<8x32xf32>
      %cst_47 = arith.constant 9.99999974E-6 : f32
      %130 = vector.broadcast %cst_47 : f32 to vector<8x1xf32>
      %131 = arith.addf %127, %130 : vector<8x1xf32>
      %132 = math.rsqrt %131 : vector<8x1xf32>
      %133 = vector.broadcast %132 : vector<8x1xf32> to vector<8x32xf32>
      %134 = arith.mulf %129, %133 : vector<8x32xf32>
      %135 = vector.broadcast %8 : vector<1x32xf32> to vector<8x32xf32>
      %136 = arith.mulf %134, %135 : vector<8x32xf32>
      %137 = vector.broadcast %9 : vector<1x32xf32> to vector<8x32xf32>
      %138 = arith.addf %136, %137 : vector<8x32xf32>
      %cst_48 = arith.constant 0.000000e+00 : f32
      %139 = vector.broadcast %cst_48 : f32 to vector<8x32xf32>
      %c0_49 = arith.constant 0 : index
      %c0_50 = arith.constant 0 : index
      %140 = vector.load %arg6[%c0_49, %c0_50] : memref<32x2048xf32, #tpu.memory_space<vmem>>, vector<32x512xf32>
      %cst_51 = arith.constant dense<0.000000e+00> : vector<8x512xf32>
      %141 = tpu.matmul %138, %140, %cst_51 {dimension_numbers = #tpu.dot_dimension_numbers<[1], [0], [0], [1], [0, 0, 1, 1], [], []>} : vector<8x32xf32>, vector<32x512xf32>, vector<8x512xf32> -> vector<8x512xf32>
      %c0_52 = arith.constant 0 : index
      %c0_53 = arith.constant 0 : index
      %142 = vector.load %arg7[%c0_52, %c0_53] : memref<1x2048xf32, #tpu.memory_space<vmem>>, vector<1x512xf32>
      %143 = vector.broadcast %142 : vector<1x512xf32> to vector<8x512xf32>
      %144 = arith.addf %141, %143 : vector<8x512xf32>
      %cst_54 = arith.constant 0.000000e+00 : f32
      %145 = vector.broadcast %cst_54 : f32 to vector<8x512xf32>
      %146 = arith.maximumf %144, %145 : vector<8x512xf32>
      %c0_55 = arith.constant 0 : index
      %c0_56 = arith.constant 0 : index
      %147 = vector.load %arg8[%c0_55, %c0_56] : memref<2048x32xf32, #tpu.memory_space<vmem>>, vector<512x32xf32>
      %cst_57 = arith.constant dense<0.000000e+00> : vector<8x32xf32>
      %148 = tpu.matmul %146, %147, %cst_57 {dimension_numbers = #tpu.dot_dimension_numbers<[1], [0], [0], [1], [0, 0, 1, 1], [], []>} : vector<8x512xf32>, vector<512x32xf32>, vector<8x32xf32> -> vector<8x32xf32>
      %149 = arith.addf %139, %148 : vector<8x32xf32>
      %c0_58 = arith.constant 0 : index
      %c512 = arith.constant 512 : index
      %150 = vector.load %arg6[%c0_58, %c512] : memref<32x2048xf32, #tpu.memory_space<vmem>>, vector<32x512xf32>
      %cst_59 = arith.constant dense<0.000000e+00> : vector<8x512xf32>
      %151 = tpu.matmul %138, %150, %cst_59 {dimension_numbers = #tpu.dot_dimension_numbers<[1], [0], [0], [1], [0, 0, 1, 1], [], []>} : vector<8x32xf32>, vector<32x512xf32>, vector<8x512xf32> -> vector<8x512xf32>
      %c0_60 = arith.constant 0 : index
      %c512_61 = arith.constant 512 : index
      %152 = vector.load %arg7[%c0_60, %c512_61] : memref<1x2048xf32, #tpu.memory_space<vmem>>, vector<1x512xf32>
      %153 = vector.broadcast %152 : vector<1x512xf32> to vector<8x512xf32>
      %154 = arith.addf %151, %153 : vector<8x512xf32>
      %cst_62 = arith.constant 0.000000e+00 : f32
      %155 = vector.broadcast %cst_62 : f32 to vector<8x512xf32>
      %156 = arith.maximumf %154, %155 : vector<8x512xf32>
      %c512_63 = arith.constant 512 : index
      %c0_64 = arith.constant 0 : index
      %157 = vector.load %arg8[%c512_63, %c0_64] : memref<2048x32xf32, #tpu.memory_space<vmem>>, vector<512x32xf32>
      %cst_65 = arith.constant dense<0.000000e+00> : vector<8x32xf32>
      %158 = tpu.matmul %156, %157, %cst_65 {dimension_numbers = #tpu.dot_dimension_numbers<[1], [0], [0], [1], [0, 0, 1, 1], [], []>} : vector<8x512xf32>, vector<512x32xf32>, vector<8x32xf32> -> vector<8x32xf32>
      %159 = arith.addf %149, %158 : vector<8x32xf32>
      %c0_66 = arith.constant 0 : index
      %c1024 = arith.constant 1024 : index
      %160 = vector.load %arg6[%c0_66, %c1024] : memref<32x2048xf32, #tpu.memory_space<vmem>>, vector<32x512xf32>
      %cst_67 = arith.constant dense<0.000000e+00> : vector<8x512xf32>
      %161 = tpu.matmul %138, %160, %cst_67 {dimension_numbers = #tpu.dot_dimension_numbers<[1], [0], [0], [1], [0, 0, 1, 1], [], []>} : vector<8x32xf32>, vector<32x512xf32>, vector<8x512xf32> -> vector<8x512xf32>
      %c0_68 = arith.constant 0 : index
      %c1024_69 = arith.constant 1024 : index
      %162 = vector.load %arg7[%c0_68, %c1024_69] : memref<1x2048xf32, #tpu.memory_space<vmem>>, vector<1x512xf32>
      %163 = vector.broadcast %162 : vector<1x512xf32> to vector<8x512xf32>
      %164 = arith.addf %161, %163 : vector<8x512xf32>
      %cst_70 = arith.constant 0.000000e+00 : f32
      %165 = vector.broadcast %cst_70 : f32 to vector<8x512xf32>
      %166 = arith.maximumf %164, %165 : vector<8x512xf32>
      %c1024_71 = arith.constant 1024 : index
      %c0_72 = arith.constant 0 : index
      %167 = vector.load %arg8[%c1024_71, %c0_72] : memref<2048x32xf32, #tpu.memory_space<vmem>>, vector<512x32xf32>
      %cst_73 = arith.constant dense<0.000000e+00> : vector<8x32xf32>
      %168 = tpu.matmul %166, %167, %cst_73 {dimension_numbers = #tpu.dot_dimension_numbers<[1], [0], [0], [1], [0, 0, 1, 1], [], []>} : vector<8x512xf32>, vector<512x32xf32>, vector<8x32xf32> -> vector<8x32xf32>
      %169 = arith.addf %159, %168 : vector<8x32xf32>
      %c0_74 = arith.constant 0 : index
      %c1536 = arith.constant 1536 : index
      %170 = vector.load %arg6[%c0_74, %c1536] : memref<32x2048xf32, #tpu.memory_space<vmem>>, vector<32x512xf32>
      %cst_75 = arith.constant dense<0.000000e+00> : vector<8x512xf32>
      %171 = tpu.matmul %138, %170, %cst_75 {dimension_numbers = #tpu.dot_dimension_numbers<[1], [0], [0], [1], [0, 0, 1, 1], [], []>} : vector<8x32xf32>, vector<32x512xf32>, vector<8x512xf32> -> vector<8x512xf32>
      %c0_76 = arith.constant 0 : index
      %c1536_77 = arith.constant 1536 : index
      %172 = vector.load %arg7[%c0_76, %c1536_77] : memref<1x2048xf32, #tpu.memory_space<vmem>>, vector<1x512xf32>
      %173 = vector.broadcast %172 : vector<1x512xf32> to vector<8x512xf32>
      %174 = arith.addf %171, %173 : vector<8x512xf32>
      %cst_78 = arith.constant 0.000000e+00 : f32
      %175 = vector.broadcast %cst_78 : f32 to vector<8x512xf32>
      %176 = arith.maximumf %174, %175 : vector<8x512xf32>
      %c1536_79 = arith.constant 1536 : index
      %c0_80 = arith.constant 0 : index
      %177 = vector.load %arg8[%c1536_79, %c0_80] : memref<2048x32xf32, #tpu.memory_space<vmem>>, vector<512x32xf32>
      %cst_81 = arith.constant dense<0.000000e+00> : vector<8x32xf32>
      %178 = tpu.matmul %176, %177, %cst_81 {dimension_numbers = #tpu.dot_dimension_numbers<[1], [0], [0], [1], [0, 0, 1, 1], [], []>} : vector<8x512xf32>, vector<512x32xf32>, vector<8x32xf32> -> vector<8x32xf32>
      %179 = arith.addf %169, %178 : vector<8x32xf32>
      %180 = vector.broadcast %10 : vector<1x32xf32> to vector<8x32xf32>
      %181 = arith.addf %179, %180 : vector<8x32xf32>
      %182 = arith.addf %138, %181 : vector<8x32xf32>
      %cst_82 = arith.constant dense<0.000000e+00> : vector<8xf32>
      %183 = vector.multi_reduction <add>, %182, %cst_82 [1] : vector<8x32xf32> to vector<8xf32>
      %184 = vector.shape_cast %183 : vector<8xf32> to vector<8x1xf32>
      %cst_83 = arith.constant 3.200000e+01 : f32
      %185 = vector.broadcast %cst_83 : f32 to vector<8x1xf32>
      %186 = arith.divf %184, %185 : vector<8x1xf32>
      %187 = vector.broadcast %186 : vector<8x1xf32> to vector<8x32xf32>
      %188 = arith.subf %182, %187 : vector<8x32xf32>
      %189 = arith.mulf %188, %188 : vector<8x32xf32>
      %cst_84 = arith.constant dense<0.000000e+00> : vector<8xf32>
      %190 = vector.multi_reduction <add>, %189, %cst_84 [1] : vector<8x32xf32> to vector<8xf32>
      %191 = vector.shape_cast %190 : vector<8xf32> to vector<8x1xf32>
      %cst_85 = arith.constant 3.200000e+01 : f32
      %192 = vector.broadcast %cst_85 : f32 to vector<8x1xf32>
      %193 = arith.divf %191, %192 : vector<8x1xf32>
      %194 = vector.broadcast %186 : vector<8x1xf32> to vector<8x32xf32>
      %195 = arith.subf %182, %194 : vector<8x32xf32>
      %cst_86 = arith.constant 9.99999974E-6 : f32
      %196 = vector.broadcast %cst_86 : f32 to vector<8x1xf32>
      %197 = arith.addf %193, %196 : vector<8x1xf32>
      %198 = math.rsqrt %197 : vector<8x1xf32>
      %199 = vector.broadcast %198 : vector<8x1xf32> to vector<8x32xf32>
      %200 = arith.mulf %195, %199 : vector<8x32xf32>
      %201 = vector.broadcast %11 : vector<1x32xf32> to vector<8x32xf32>
      %202 = arith.mulf %200, %201 : vector<8x32xf32>
      %203 = vector.broadcast %12 : vector<1x32xf32> to vector<8x32xf32>
      %204 = arith.addf %202, %203 : vector<8x32xf32>
      scf.yield %204 : vector<8x32xf32>
    }
    %19 = vector.broadcast %1 : vector<8x1xf32> to vector<8x32xf32>
    %20 = arith.mulf %18, %19 : vector<8x32xf32>
    %c0_7 = arith.constant 0 : index
    %c0_8 = arith.constant 0 : index
    %21 = vector.load %arg9[%c0_7, %c0_8] : memref<32x128xf32, #tpu.memory_space<vmem>>, vector<32x128xf32>
    %cst_9 = arith.constant dense<0.000000e+00> : vector<8x128xf32>
    %22 = tpu.matmul %20, %21, %cst_9 {dimension_numbers = #tpu.dot_dimension_numbers<[1], [0], [0], [1], [0, 0, 1, 1], [], []>} : vector<8x32xf32>, vector<32x128xf32>, vector<8x128xf32> -> vector<8x128xf32>
    %c0_10 = arith.constant 0 : index
    %c0_11 = arith.constant 0 : index
    %23 = vector.load %arg10[%c0_10, %c0_11] : memref<1x128xf32, #tpu.memory_space<vmem>>, vector<1x128xf32>
    %24 = vector.broadcast %23 : vector<1x128xf32> to vector<8x128xf32>
    %25 = arith.addf %22, %24 : vector<8x128xf32>
    %c0_12 = arith.constant 0 : index
    %c0_13 = arith.constant 0 : index
    %26 = vector.load %arg12[%c0_12, %c0_13] : memref<8x128xf32, #tpu.memory_space<vmem>>, vector<8x128xf32>
    tpu.vector_store %arg12[%c0_12, %c0_13], %25 {strides = array<i32>} : memref<8x128xf32, #tpu.memory_space<vmem>>, vector<8x128xf32>,
    return
  }
  func.func @transform_0(%arg0: i32) -> (i32, i32) {
    %c0_i32 = arith.constant 0 : i32
    %c0_i32_0 = arith.constant 0 : i32
    return %arg0, %c0_i32 : i32, i32
  }
  func.func @transform_1(%arg0: i32) -> (i32, i32) {
    %c0_i32 = arith.constant 0 : i32
    %c0_i32_0 = arith.constant 0 : i32
    return %arg0, %c0_i32 : i32, i32
  }
  func.func @transform_2(%arg0: i32) -> (i32, i32) {
    %c0_i32 = arith.constant 0 : i32
    %c0_i32_0 = arith.constant 0 : i32
    %c0_i32_1 = arith.constant 0 : i32
    return %c0_i32, %c0_i32_0 : i32, i32
  }
  func.func @transform_3(%arg0: i32) -> (i32, i32) {
    %c0_i32 = arith.constant 0 : i32
    %c0_i32_0 = arith.constant 0 : i32
    %c0_i32_1 = arith.constant 0 : i32
    return %c0_i32, %c0_i32_0 : i32, i32
  }
  func.func @transform_4(%arg0: i32) -> (i32, i32) {
    %c0_i32 = arith.constant 0 : i32
    %c0_i32_0 = arith.constant 0 : i32
    %c0_i32_1 = arith.constant 0 : i32
    return %c0_i32, %c0_i32_0 : i32, i32
  }
  func.func @transform_5(%arg0: i32) -> (i32, i32) {
    %c0_i32 = arith.constant 0 : i32
    %c0_i32_0 = arith.constant 0 : i32
    %c0_i32_1 = arith.constant 0 : i32
    return %c0_i32, %c0_i32_0 : i32, i32
  }
  func.func @transform_6(%arg0: i32) -> (i32, i32) {
    %c0_i32 = arith.constant 0 : i32
    %c0_i32_0 = arith.constant 0 : i32
    %c0_i32_1 = arith.constant 0 : i32
    return %c0_i32, %c0_i32_0 : i32, i32
  }
  func.func @transform_7(%arg0: i32) -> (i32, i32) {
    %c0_i32 = arith.constant 0 : i32
    %c0_i32_0 = arith.constant 0 : i32
    %c0_i32_1 = arith.constant 0 : i32
    return %c0_i32, %c0_i32_0 : i32, i32
  }
  func.func @transform_8(%arg0: i32) -> (i32, i32) {
    %c0_i32 = arith.constant 0 : i32
    %c0_i32_0 = arith.constant 0 : i32
    %c0_i32_1 = arith.constant 0 : i32
    return %c0_i32, %c0_i32_0 : i32, i32
  }
  func.func @transform_9(%arg0: i32) -> (i32, i32) {
    %c0_i32 = arith.constant 0 : i32
    %c0_i32_0 = arith.constant 0 : i32
    %c0_i32_1 = arith.constant 0 : i32
    return %c0_i32, %c0_i32_0 : i32, i32
  }
  func.func @transform_10(%arg0: i32) -> (i32, i32) {
    %c0_i32 = arith.constant 0 : i32
    %c0_i32_0 = arith.constant 0 : i32
    %c0_i32_1 = arith.constant 0 : i32
    return %c0_i32, %c0_i32_0 : i32, i32
  }
  func.func @transform_11(%arg0: i32) -> (i32, i32) {
    %c0_i32 = arith.constant 0 : i32
    %c0_i32_0 = arith.constant 0 : i32
    return %arg0, %c0_i32 : i32, i32
  }
}

</mosaic_0001>

<bundles_post_ra>
// kernel: tpu_custom_call.1
= control target key start
LH: loop header
LB: loop body
LE: loop exit
PB: predicated region body
PF: predicated region fallthrough
CT: control target
= control target key end

     0   :  { %s3649_s0 = inlined_call_operand.vmem [shape: f32[16,4], index: 0, kind: input, shape index: {}]   ;;  %s3650_s1 = inlined_call_operand.vmem [shape: f32[16,1], index: 1, kind: input, shape index: {}]   ;;  %s3651_s2 = inlined_call_operand.vmem [shape: f32[4,32], index: 2, kind: input, shape index: {}]   ;;  %s3652_s3 = inlined_call_operand.vmem [shape: f32[32,96], index: 3, kind: input, shape index: {}]   ;;  %s3653_s4 = inlined_call_operand.vmem [shape: f32[32,32], index: 4, kind: input, shape index: {}]   ;;  %s3654_s5 = inlined_call_operand.vmem [shape: f32[32,2048], index: 5, kind: input, shape index: {}]   ;;  %s3655_s6 = inlined_call_operand.vmem [shape: f32[1,2048], index: 6, kind: input, shape index: {}]   ;;  %s3656_s7 = inlined_call_operand.vmem [shape: f32[2048,32], index: 7, kind: input, shape index: {}]   ;;  %s3657_s8 = inlined_call_operand.vmem [shape: f32[32,128], index: 8, kind: input, shape index: {}]   ;;  %s3658_s9 = inlined_call_operand.vmem [shape: f32[1,128], index: 9, kind: input, shape index: {}]   ;;  %s3659_s10 = inlined_call_operand.vmem [shape: f32[10,32], index: 10, kind: input, shape index: {}]   ;;  %s3660_s11 = inlined_call_operand.hbm [shape: f32[16,128], index: 11, kind: output, shape index: {}]  }
   0x1   :  { %3663 = sst [smem:[#allocation7_spill]] %s3649_s0 }
   0x2   :  { %3664 = sst [smem:[#allocation8_spill]] %s3650_s1 }
   0x3   :  { %16 = vsyncpa [#allocation3], 0 }
   0x4   :  { %18 = vsyncpa [#allocation3 + $0x1], 0  ;;  %s2408_s17 = smov 0   ;;  %s2410_s18 = smov 0  }
   0x5   :  { %s2412_s19 = smov 0   ;;  %s2414_s20 = smov 0  }
   0x6 LB: > { %3665 = sst [smem:[#allocation5_spill]] %s2320_s19  ;;  %s2429_s21 = sadd.s32 4294967295, %s2324_s20   ;;  %s2324_s20 = sphi %s2414_s20, %s3679_s20   ;;  %s2320_s19 = sphi %s2412_s19, %s3676_s19   ;;  %s2316_s18 = sphi %s2410_s18, %s3678_s18   ;;  %s2312_s17 = sphi %s2408_s17, %s3677_s17  }
   0x7   : > { %s2114_s22 = sadd.s32 4294967294, %s2324_s20   ;;  %s2433_s23 = sadd.s32 1, %s2324_s20  }
   0x8   : > { %s272_s24 = sadd.s32 1, %s2320_s19  ;;  %s269_s25 = ssub.s32 %s2324_s20, %s2433_s23 }
   0x9   : > { %p282_p0 = scmp.ne.s32.totalorder %s2320_s19, %s2316_s18  ;;  %p270_p1 = scmp.eq.s32.totalorder %s269_s25, 0 }
   0xa   : > { %p283_p2 = scmp.eq.s32.totalorder %s2429_s21, 1  ;;  %p288_p3 = scmp.ne.s32.totalorder %s2316_s18, %s2312_s17 }
   0xb   : > { %p289_p4 = scmp.eq.s32.totalorder %s2114_s22, 1  ;;  %p2117_p7 = scmp.ge.s32.totalorder %s2324_s20, 1 }
   0xc   : > { %s2444_s26 = scalar_select %p270_p1, %s2320_s19, %s272_s24  }
   0xd   : > { %p2446_p5 = por %p283_p2, %p282_p0  ;;  %p2450_p6 = por %p289_p4, %p288_p3 }
   0xe   : > { %3666 = sst [smem:[#allocation6_spill]] %s2444_s26  ;;  %p348_p8 = scmp.lt.s32.totalorder %s2324_s20, 3 }
  0x10   : > { %p349_p9 = pnand %p2117_p7, %p348_p8 }
  0x11   : > { %s3662_s29 = sand.u32 (!%p349_p9), 1, %s2316_s18   ;;  %p391_p10 = scmp.lt.s32.totalorder (!%p349_p9), %s2429_s21, 1 }
  0x12   : > { %352 = sbr.rel (%p349_p9) target bundleno = 2852 (0xb24), region = 64  ;;  %s2467_s15 = sshll.u32 (!%p349_p9), %s3662_s29, 3 }
  0x13   : > { %s3669_s0 = sld [smem:[#allocation7_spill]] (!%p349_p9)  ;;  %s2488_s24 = smov (!%p349_p9), 0  }
  0x14   : > { %s3670_s1 = sld [smem:[#allocation8_spill]] (!%p349_p9) }
  0x17   : > { %v2460_v0 = vld [vmem:[%s3659_s10 + $0x8] sm:$0x3]  ;;  %v403_v1 = vld [vmem:[%s3651_s2] sm:$0xf]  ;;  %vm409_vm0 = vcmask 1043456   ;;  %s392_s16 = scalar_select %p391_p10, %s2429_s21, 1 }
  0x18   : > { %2121 = vmatpush.msk.msra.mxu0 %vm409_vm0, %v403_v1  ;;  %vm405_vm1 = vcmask 31744   ;;  %v2482_v4 = vld [vmem:[%s3659_s10] sm:$0xff] }
  0x19   : > { %s2119_s22 = sshll.u32 %s392_s16, 3  ;;  %v404_v5 = vperm.slane %v2482_v4, 0 }
  0x1a   : > { %s394_s30 = scalar_lea.vmem %s3669_s0, %s2119_s22  ;;  %s398_s19 = scalar_lea.vmem %s3670_s1, %s2119_s22 }
  0x1b   : > { %v399_v2 = vld [vmem:[%s394_s30] sm:$0xff] }
  0x1c   : > { %v2477_v3 = vld [vmem:[%s398_s19] sm:$0xff]  ;;  %2122 = vmatmul.msk.f32.vlgmr.msra.gmra.mxu0 %vm405_vm1, %v399_v2 }
  0x99   : > { %v430_v6 = vpop.f32.mrf.mxu0 }
  0x9a   : > { %v431_v7 = vadd.f32 %v430_v6, %v404_v5  }
  0x9b LB: >> { %v443_v8 = vld [vmem:[%s3652_s3 + $0x18] sm:$0xff]  ;;  %v442_v9 = vld [vmem:[%s3652_s3 + $0x10] sm:$0xff]  ;;  %v470_v10 = vperm.slane %v2482_v4, 2  ;;  %v441_v11 = vld [vmem:[%s3652_s3 + $0x8] sm:$0xff]  ;;  %s2334_s13 = smov 32   ;;  %vm444_vm2 = vcmask 261120   ;;  %s2332_s24 = sphi %s2488_s24, %s438_s24   ;;  %v2328_v7 = vphi %v431_v7, %v3671_v7  }
  0x9c   : >> { %460 = vmatpush.msra.mxu0 %v443_v8  ;;  %v440_v12 = vld [vmem:[%s3652_s3] sm:$0xff]  ;;  %s2335_s19 = smov 96   ;;  %s2336_s26 = smov 88   ;;  %v468_v16 = vperm.slane %v2482_v4, 1  ;;  %vm485_vm3 = vcmask 64512   ;;  %v476_v25 = vperm.slane %v2482_v4, 3 }
  0x9d   : >> { %472 = vrot.lane.b32.xlu0 %v470_v10, %s2334_s13  ;;  %s2337_s22 = smov 120   ;;  %s2338_s29 = smov 72   ;;  %v562_v19 = vld [vmem:[%s3653_s4] sm:$0xff] }
  0x9e   : >> { %461 = vmatpush.msra.mxu0 %v442_v9  ;;  %s2339_s25 = smov 112   ;;  %s2340_s13 = smov 64  }
  0x9f   : >> { %s2341_s14 = smov 80   ;;  %s438_s24 = sadd.s32 1, %s2332_s24  }
  0xa0   : >> { %462 = vmatpush.msra.mxu0 %v441_v11  ;;  %p435_p11 = scmp.ge.s32.totalorder %s438_s24, 3  }
  0xa1   : > { %s3674_s24 = sand.u32 (%p435_p11), 1, %s2316_s18  }
  0xa2   : >> { %463 = vmatpush.msra.mxu0 %v440_v12 }
  0xa3   : >> { %2123 = vmatmul.msk.f32.vlgmr.msra.gmra.mxu0 %vm444_vm2, %v2328_v7 }
 0x10f   : >> { %v473_v13 = vpop.permute.xlu0 %472 }
 0x120   : >> { %v465_v14 = vpop.f32.mrf.mxu0 }
 0x121   : >> { %v475_v15 = vadd.f32 %v473_v13, %v465_v14  ;;  %v469_v17 = vadd.f32 %v468_v16, %v465_v14 }
 0x123   : >> { %483 = vrot.lane.b32.xlu0 %v475_v15, %s2335_s19  ;;  %s2342_s19 = smov 104  }
 0x12b   : >> { %565 = vrot.lane.b32.xlu0 %v475_v15, %s2336_s26  ;;  %s2343_s26 = smov 48  }
 0x133   : >> { %563 = vrot.lane.b32.xlu0 %v469_v17, %s2337_s22  ;;  %s2344_s22 = smov 56  }
 0x13b   : >> { %793 = vrot.lane.b32.xlu0 %v475_v15, %s2338_s29  ;;  %s2345_s29 = smov 40  }
 0x143   : >> { %688 = vrot.lane.b32.xlu0 %v469_v17, %s2339_s25 }
 0x195   : >> { %v484_v18 = vpop.permute.xlu0 %483 }
 0x196   : >> { %2124 = vmatpush.xpose.msk.msra.mxu1 %vm485_vm3, %v484_v18 }
 0x199   : >> { %2125 = vmatmul.msk.f32.vlgmr.msra.gmra.mxu1 %vm485_vm3, %v469_v17 }
 0x19d   : >> { %v566_v20 = vpop.permute.xlu0 %565 }
 0x19e   : >> { %2127 = vmatpush.xpose.msk.msra.mxu3 %vm485_vm3, %v566_v20 }
 0x1a2   : >> { %683 = vmatpush.msrb.mxu3 %v562_v19 }
 0x1a5   : >> { %v564_v21 = vpop.permute.xlu0 %563 }
 0x1a6   : >> { %2128 = vmatmul.msk.f32.vlgmr.msra.gmra.mxu3 %vm485_vm3, %v564_v21 }
 0x1ad   : >> { %v794_v22 = vpop.permute.xlu0 %793 }
 0x1ae   : >> { %2136 = vmatpush.xpose.msk.msra.mxu3 %vm485_vm3, %v794_v22 }
 0x1b5   : >> { %v689_v33 = vpop.permute.xlu0 %688 }
 0x216   : >> { %v508_v23 = vpop.f32.mrf.mxu1 }
 0x217   : >> { %v511_v24 = vsel %vm485_vm3, %v508_v23, -inf }
 0x218   : >> { %512 = vmax.xlane.f32.xlu1 %v511_v24 }
 0x229   : >> { %v588_v35 = vpop.f32.mrf.mxu3 }
 0x22a   : >> { %v591_v36 = vsel %vm485_vm3, %v588_v35, -inf }
 0x231   : >> { %478 = vrot.lane.b32.xlu1 %v476_v25, %s2340_s13 }
 0x239   : >> { %690 = vrot.lane.b32.xlu1 %v475_v15, %s2341_s14 }
 0x28b   : >> { %v513_v26 = vpop.xlane.xlu1 %512 }
 0x28c   : >> { %v514_v27 = vsub.f32 %v508_v23, %v513_v26 }
 0x28e   : >> { %v515_v28 = vmul.f32 1.442695, %v514_v27 }
 0x290   : >> { %2230 = vpow2.f32 %v515_v28 }
 0x296   : >> { %v2231_v29 = vpop.eup %2230 }
 0x297   : >> { %v517_v30 = vsel %vm485_vm3, %v2231_v29, 0.0 }
 0x298   : >> { %518 = vadd.xlane.f32.xlu2 %v517_v30 }
 0x2a3   : >> { %v479_v31 = vpop.permute.xlu1 %478 }
 0x2a4   : >> { %v2524_v34 = vadd.f32 %v479_v31, %v465_v14 }
 0x2ab   : >> { %v691_v32 = vpop.permute.xlu1 %690 }
 0x2ac   : >> { %2132 = vmatpush.xpose.msk.msrb.mxu0 %vm485_vm3, %v691_v32 }
 0x2af   : >> { %2133 = vmatmul.msk.f32.vlgmr.msrb.gmra.mxu0 %vm485_vm3, %v689_v33 }
 0x2b0   : >> { %536 = vrot.lane.b32.xlu2 %v2524_v34, %s2340_s13  ;;  %s3672_s13 = scalar_lea.vmem (%p435_p11), [#allocation2], %s2467_s15 }
 0x2b1   : > { %s2032_s14 = sshll.u32 (%p435_p11), %s3672_s13, 4  ;;  %s3673_s0 = smov (%p435_p11), %s3672_s13  ;;  %s2033_s14 = int_to_ptr.vmem [resolvable:$true] %s2032_s14 }
 0x2b8   : >> { %791 = vrot.lane.b32.xlu2 %v469_v17, %s2342_s19  ;;  %s2020_s19 = scalar_lea.sflag (%p435_p11), [#allocation3], %s3674_s24 }
 0x2e1   : >> { %592 = vmax.xlane.f32.xlu2 %v591_v36 }
 0x30b   : >> { %v519_v37 = vpop.xlane.xlu2 %518 }
 0x30c   : >> { %2232 = vrcp.f32 %v519_v37  ;;  %v531_v42 = vand.u32 2147483648, %v519_v37  ;;  %v529_v44 = vand.u32 2147483647, %v519_v37  ;;  %vm525_vm5 = vweird.f32 %v519_v37 }
 0x30e   : >> { %v532_v46 = vor.u32 1.1754944e-38, %v531_v42  ;;  %vm530_vm7 = vcmp.eq.f32.partialorder %v529_v44, 8.507059e+37  ;;  %v869_v42 = vld [vmem:[%s3653_s4 + $0x18] sm:$0xff] }
 0x312   : >> { %v2233_v38 = vpop.eup %2232 }
 0x313   : >> { %v521_v39 = vmul.f32 %v2233_v38, %v519_v37  ;;  %v537_v40 = vpop.permute.xlu2 %536  ;;  %vm526_vm4 = vweird.f32 %v2233_v38 }
 0x314   : >> { %557 = vmatpush.msra.mxu2 %v537_v40  ;;  %vm527_vm6 = vmor %vm525_vm5, %vm526_vm4 }
 0x315   : >> { %v522_v41 = vsub.f32 1.0, %v521_v39  ;;  %v641_v39 = vld [vmem:[%s3653_s4 + $0x8] sm:$0xff] }
 0x316   : >> { %660 = vmatpush.msrb.mxu1 %v641_v39  ;;  %v1116_v39 = vld [vmem:[%s3654_s5 + $0x128] sm:$0xff] }
 0x317   : >> { %v523_v43 = vmul.f32 %v2233_v38, %v522_v41  ;;  %v766_v41 = vld [vmem:[%s3653_s4 + $0x10] sm:$0xff] }
 0x318   : >> { %785 = vmatpush.msra.mxu1 %v766_v41 }
 0x319   : >> { %v524_v45 = vadd.f32 %v2233_v38, %v523_v43 }
 0x31b   : >> { %v528_v47 = vsel %vm527_vm6, %v2233_v38, %v524_v45  ;;  %v792_v52 = vpop.permute.xlu2 %791 }
 0x31c   : >> { %v533_v48 = vsel %vm530_vm7, %v532_v46, %v528_v47 }
 0x31d   : >> { %v534_v49 = vmul.f32 %v2231_v29, %v533_v48 }
 0x31f   : >> { %2126 = vmatmul.msk.f32.vlgmr.msra.gmra.mxu2 %vm485_vm3, %v534_v49 }
 0x32c   : >> { %v713_v50 = vpop.f32.mrf.mxu0 }
 0x32d   : >> { %v716_v51 = vsel %vm485_vm3, %v713_v50, -inf }
 0x32e   : >> { %717 = vmax.xlane.f32.xlu1 %v716_v51 }
 0x354   : >> { %v593_v53 = vpop.xlane.xlu2 %592 }
 0x355   : >> { %v594_v54 = vsub.f32 %v588_v35, %v593_v53 }
 0x357   : >> { %v595_v55 = vmul.f32 1.442695, %v594_v54 }
 0x359   : >> { %2234 = vpow2.f32 %v595_v55 }
 0x35f   : >> { %v2235_v56 = vpop.eup %2234 }
 0x360   : >> { %v597_v57 = vsel %vm485_vm3, %v2235_v56, 0.0 }
 0x361   : >> { %598 = vadd.xlane.f32.xlu2 %v597_v57 }
 0x3a1   : >> { %v718_v58 = vpop.xlane.xlu1 %717 }
 0x3a2   : >> { %v719_v59 = vsub.f32 %v713_v50, %v718_v58  ;;  %v559_v60 = vpop.f32.mrf.mxu2 }
 0x3a3   : >> { %2131 = vmatmul.msk.f32.vlgmr.msrb.gmra.mxu3 %vm485_vm3, %v559_v60 }
 0x3a4   : >> { %v720_v61 = vmul.f32 1.442695, %v719_v59 }
 0x3a6   : >> { %2236 = vpow2.f32 %v720_v61  ;;  %v894_v61 = vperm.slane %v2482_v4, 4 }
 0x3ab   : >> { %2137 = vmatmul.msk.f32.vlgmr.msra.gmra.mxu3 %vm485_vm3, %v792_v52 }
 0x3ac   : >> { %v2237_v62 = vpop.eup %2236 }
 0x3ad   : >> { %v722_v63 = vsel %vm485_vm3, %v2237_v62, 0.0 }
 0x3ae   : >> { %723 = vadd.xlane.f32.xlu1 %v722_v63 }
 0x3c7   : >> { %740 = vrot.lane.b32.xlu1 %v2524_v34, %s2343_s26  ;;  %s2158_s26 = sshll.u32 (%p435_p11), %s2429_s21, 3 }
 0x3c8   : > { %s2030_s25 = scalar_lea.hbm (%p435_p11), %s3660_s11, %s2158_s26 }
 0x3c9   : > { %s2034_s16 = sshll.u32 (%p435_p11), %s2030_s25, 4  ;;  %s2035_s16 = int_to_ptr.hbm [resolvable:$true] %s2034_s16 }
 0x3ca   : > { %s2268_s21 = sshra.s32 (%p435_p11), %s2035_s16, 4  ;;  %s2269_s21 = int_to_ptr.hbm [resolvable:$true] %s2268_s21 }
 0x3cb   : > { %s2270_s1 = scalar_lea.hbm (%p435_p11), %s2269_s21, 8  ;;  %p2275_p1 = scmp.lt.s32.totalorder (%p435_p11), %s2269_s21, %s3660_s11 }
 0x3cc   : > { %p2271_p12 = scmp.ne.s32.totalorder (%p435_p11), %s2269_s21, %s2270_s1 }
 0x3ce   : > { %p2272_p13 = pnand (%p435_p11), %p2271_p12, %p2446_p5 }
 0x3d0   : > { %p2273_p0 = pneg (%p435_p11), %p2272_p13 }
 0x3d4   : >> { %v599_v6 = vpop.xlane.xlu2 %598 }
 0x3d5   : >> { %2238 = vrcp.f32 %v599_v6  ;;  %v611_v20 = vand.u32 2147483648, %v599_v6  ;;  %vm605_vm9 = vweird.f32 %v599_v6  ;;  %v609_v22 = vand.u32 2147483647, %v599_v6 }
 0x3d7   : >> { %v612_v26 = vor.u32 1.1754944e-38, %v611_v20  ;;  %vm610_vm11 = vcmp.eq.f32.partialorder %v609_v22, 8.507059e+37  ;;  %v944_v20 = vld [vmem:[%s3654_s5 + $0x190] sm:$0xff]  ;;  %v939_v22 = vld [vmem:[%s3654_s5 + $0x108] sm:$0xff] }
 0x3db   : >> { %v2239_v9 = vpop.eup %2238 }
 0x3dc   : >> { %v601_v10 = vmul.f32 %v2239_v9, %v599_v6  ;;  %vm606_vm8 = vweird.f32 %v2239_v9 }
 0x3dd   : >> { %vm607_vm10 = vmor %vm605_vm9, %vm606_vm8 }
 0x3de   : >> { %v602_v12 = vsub.f32 1.0, %v601_v10 }
 0x3e0   : >> { %v603_v16 = vmul.f32 %v2239_v9, %v602_v12 }
 0x3e2   : >> { %v604_v18 = vadd.f32 %v2239_v9, %v603_v16 }
 0x3e4   : >> { %v608_v25 = vsel %vm607_vm10, %v2239_v9, %v604_v18  ;;  %v943_v18 = vld [vmem:[%s3654_s5 + $0x188] sm:$0xff] }
 0x3e5   : >> { %v613_v27 = vsel %vm610_vm11, %v612_v26, %v608_v25  ;;  %991 = vmatpush.msrb.mxu3 %v943_v18  ;;  %v941_v25 = vld [vmem:[%s3654_s5 + $0x118] sm:$0xff]  ;;  %v935_v26 = vld [vmem:[%s3654_s5 + $0x88] sm:$0xff]  ;;  %v1261_v18 = vld [vmem:[%s3656_s7 + $0x360] sm:$0xff] }
 0x3e6   : >> { %v614_v32 = vmul.f32 %v2235_v56, %v613_v27  ;;  %v934_v27 = vld [vmem:[%s3654_s5 + $0x80] sm:$0xff] }
 0x3e7   : >> { %992 = vmatpush.msrb.mxu3 %v939_v22  ;;  %v1260_v22 = vld [vmem:[%s3656_s7 + $0x358] sm:$0xff] }
 0x3e9   : >> { %993 = vmatpush.msrb.mxu3 %v935_v26  ;;  %v1259_v26 = vld [vmem:[%s3656_s7 + $0x350] sm:$0xff] }
 0x421   : >> { %v724_v8 = vpop.xlane.xlu1 %723 }
 0x422   : >> { %2240 = vrcp.f32 %v724_v8  ;;  %v736_v29 = vand.u32 2147483648, %v724_v8  ;;  %vm730_vm13 = vweird.f32 %v724_v8  ;;  %v734_v30 = vand.u32 2147483647, %v724_v8 }
 0x424   : >> { %v737_v36 = vor.u32 1.1754944e-38, %v736_v29  ;;  %vm735_vm15 = vcmp.eq.f32.partialorder %v734_v30, 8.507059e+37  ;;  %v937_v29 = vld [vmem:[%s3654_s5 + $0x98] sm:$0xff]  ;;  %v931_v30 = vld [vmem:[%s3654_s5 + $0x8] sm:$0xff] }
 0x425   : >> { %994 = vmatpush.msrb.mxu3 %v931_v30  ;;  %v1258_v30 = vld [vmem:[%s3656_s7 + $0x348] sm:$0xff] }
 0x426   : >> { %v2536_v1 = vpop.f32.mrf.mxu3 }
 0x428   : >> { %v2241_v14 = vpop.eup %2240 }
 0x429   : >> { %v726_v17 = vmul.f32 %v2241_v14, %v724_v8  ;;  %vm731_vm12 = vweird.f32 %v2241_v14  ;;  %v2346_v8 = vmov 32.0  }
 0x42a   : >> { %vm732_vm14 = vmor %vm730_vm13, %vm731_vm12 }
 0x42b   : >> { %v727_v19 = vsub.f32 1.0, %v726_v17 }
 0x42d   : >> { %v728_v24 = vmul.f32 %v2241_v14, %v727_v19  ;;  %v942_v19 = vld [vmem:[%s3654_s5 + $0x180] sm:$0xff] }
 0x42e   : >> { %v816_v2 = vpop.f32.mrf.mxu3 }
 0x42f   : >> { %v819_v5 = vsel %vm485_vm3, %v816_v2, -inf  ;;  %v729_v28 = vadd.f32 %v2241_v14, %v728_v24  ;;  %v940_v24 = vld [vmem:[%s3654_s5 + $0x110] sm:$0xff] }
 0x430   : >> { %820 = vmax.xlane.f32.xlu0 %v819_v5 }
 0x431   : >> { %v733_v33 = vsel %vm732_vm14, %v2241_v14, %v729_v28  ;;  %v936_v28 = vld [vmem:[%s3654_s5 + $0x90] sm:$0xff] }
 0x432   : >> { %v738_v37 = vsel %vm735_vm15, %v737_v36, %v733_v33  ;;  %v933_v33 = vld [vmem:[%s3654_s5 + $0x18] sm:$0xff]  ;;  %v1119_v36 = vld [vmem:[%s3654_s5 + $0x1a0] sm:$0xff] }
 0x433   : >> { %v739_v38 = vmul.f32 %v2237_v62, %v738_v37  ;;  %v1121_v37 = vld [vmem:[%s3654_s5 + $0x1b0] sm:$0xff] }
 0x439   : >> { %v741_v35 = vpop.permute.xlu1 %740 }
 0x444   : >> { %615 = vrot.lane.b32.xlu0 %v2524_v34, %s2344_s22 }
 0x4a3   : >> { %v821_v11 = vpop.xlane.xlu0 %820 }
 0x4a4   : >> { %v822_v13 = vsub.f32 %v816_v2, %v821_v11 }
 0x4a6   : >> { %v823_v15 = vmul.f32 1.442695, %v822_v13 }
 0x4a8   : >> { %2242 = vpow2.f32 %v823_v15 }
 0x4ae   : >> { %v2243_v21 = vpop.eup %2242 }
 0x4af   : >> { %v825_v23 = vsel %vm485_vm3, %v2243_v21, 0.0 }
 0x4b0   : >> { %826 = vadd.xlane.f32.xlu2 %v825_v23  ;;  %v938_v23 = vld [vmem:[%s3654_s5 + $0x100] sm:$0xff] }
 0x4b6   : >> { %v616_v31 = vpop.permute.xlu0 %615 }
 0x4b7   : >> { %636 = vmatpush.msrb.mxu2 %v616_v31  ;;  %v930_v31 = vld [vmem:[%s3654_s5] sm:$0xff] }
 0x4b8   : >> { %2129 = vmatmul.msk.f32.vlgmr.msrb.gmra.mxu2 %vm485_vm3, %v614_v32  ;;  %v932_v32 = vld [vmem:[%s3654_s5 + $0x10] sm:$0xff] }
 0x4b9   : >> { %761 = vmatpush.msra.mxu2 %v741_v35  ;;  %v1120_v35 = vld [vmem:[%s3654_s5 + $0x1a8] sm:$0xff] }
 0x4ba   : >> { %1165 = vmatpush.msra.mxu3 %v1120_v35  ;;  %v1257_v35 = vld [vmem:[%s3656_s7 + $0x340] sm:$0xff] }
 0x4bb   : >> { %888 = vmatpush.msrb.mxu2 %v869_v42  ;;  %v1117_v42 = vld [vmem:[%s3654_s5 + $0x130] sm:$0xff] }
 0x4bc   : >> { %1166 = vmatpush.msra.mxu3 %v1116_v39  ;;  %v1256_v39 = vld [vmem:[%s3656_s7 + $0x338] sm:$0xff] }
 0x4c0   : >> { %2134 = vmatmul.msk.f32.vlgmr.msra.gmra.mxu2 %vm485_vm3, %v739_v38  ;;  %v1122_v38 = vld [vmem:[%s3654_s5 + $0x1b8] sm:$0xff] }
 0x4c8   : >> { %843 = vrot.lane.b32.xlu2 %v2524_v34, %s2345_s29  ;;  %s2274_s29 = scalar_lea.hbm (%p435_p11), %s3660_s11, 16 }
 0x4c9   : > { %p2276_p2 = scmp.lt.s32.totalorder (%p435_p11), %s2274_s29, %s2270_s1 }
 0x4cb   : > { %p2277_p3 = por (%p435_p11), %p2276_p2, %p2275_p1 }
 0x4cd   : > { %p2278_p4 = pnand (%p435_p11), %p2277_p3, %p2273_p0 }
 0x523   : >> { %v827_v40 = vpop.xlane.xlu2 %826 }
 0x524   : >> { %2244 = vrcp.f32 %v827_v40  ;;  %v839_v46 = vand.u32 2147483648, %v827_v40  ;;  %v837_v48 = vand.u32 2147483647, %v827_v40  ;;  %vm833_vm1 = vweird.f32 %v827_v40 }
 0x525   : >> { %2246 = vrcp.f32 %v2346_v8  ;;  %v1248_v8 = vld [vmem:[%s3656_s7 + $0x2f8] sm:$0xff] }
 0x526   : >> { %v840_v50 = vor.u32 1.1754944e-38, %v839_v46  ;;  %vm838_vm5 = vcmp.eq.f32.partialorder %v837_v48, 8.507059e+37  ;;  %v1113_v46 = vld [vmem:[%s3654_s5 + $0xb0] sm:$0xff]  ;;  %v1108_v48 = vld [vmem:[%s3654_s5 + $0x28] sm:$0xff] }
 0x52a   : >> { %v2245_v43 = vpop.eup %2244 }
 0x52b   : >> { %v829_v44 = vmul.f32 %v2245_v43, %v827_v40  ;;  %v844_v34 = vpop.permute.xlu2 %843  ;;  %vm834_vm0 = vweird.f32 %v2245_v43  ;;  %v2247_v9 = vpop.eup %2246  ;;  %v1115_v40 = vld [vmem:[%s3654_s5 + $0x120] sm:$0xff] }
 0x52c   : >> { %864 = vmatpush.msra.mxu0 %v844_v34  ;;  %vm835_vm4 = vmor %vm833_vm1, %vm834_vm0  ;;  %v901_v10 = vmul.f32 32.0, %v2247_v9 }
 0x52d   : >> { %v830_v45 = vsub.f32 1.0, %v829_v44  ;;  %v1112_v44 = vld [vmem:[%s3654_s5 + $0xa8] sm:$0xff] }
 0x52e   : >> { %v902_v11 = vsub.f32 1.0, %v901_v10  ;;  %1011 = vmatpush.msrb.mxu0 %v944_v20  ;;  %1167 = vmatpush.msra.mxu3 %v1112_v44  ;;  %v1231_v10 = vld [vmem:[%s3656_s7 + $0x270] sm:$0xff]  ;;  %v1277_v20 = vld [vmem:[%s3656_s7 + $0x3e0] sm:$0xff] }
 0x52f   : >> { %v831_v47 = vmul.f32 %v2245_v43, %v830_v45  ;;  %v1111_v45 = vld [vmem:[%s3654_s5 + $0xa0] sm:$0xff]  ;;  %v1239_v44 = vld [vmem:[%s3656_s7 + $0x2b0] sm:$0xff] }
 0x530   : >> { %v903_v12 = vmul.f32 %v2247_v9, %v902_v11  ;;  %1012 = vmatpush.msrb.mxu0 %v940_v24  ;;  %1168 = vmatpush.msra.mxu3 %v1108_v48  ;;  %v1263_v11 = vld [vmem:[%s3656_s7 + $0x370] sm:$0xff]  ;;  %v1276_v24 = vld [vmem:[%s3656_s7 + $0x3d8] sm:$0xff]  ;;  %v1270_v48 = vld [vmem:[%s3656_s7 + $0x3a8] sm:$0xff] }
 0x531   : >> { %v832_v49 = vadd.f32 %v2245_v43, %v831_v47  ;;  %v1114_v47 = vld [vmem:[%s3654_s5 + $0xb8] sm:$0xff] }
 0x532   : >> { %v904_v13 = vadd.f32 %v2247_v9, %v903_v12  ;;  %1013 = vmatpush.msrb.mxu0 %v936_v28  ;;  %v1247_v12 = vld [vmem:[%s3656_s7 + $0x2f0] sm:$0xff] }
 0x533   : >> { %v836_v51 = vsel %vm835_vm4, %v2245_v43, %v832_v49  ;;  %v1118_v43 = vld [vmem:[%s3654_s5 + $0x138] sm:$0xff]  ;;  %v1107_v49 = vld [vmem:[%s3654_s5 + $0x20] sm:$0xff]  ;;  %v1275_v28 = vld [vmem:[%s3656_s7 + $0x3d0] sm:$0xff] }
 0x534   : >> { %v841_v52 = vsel %vm838_vm5, %v840_v50, %v836_v51  ;;  %1014 = vmatpush.msrb.mxu0 %v932_v32  ;;  %v1109_v51 = vld [vmem:[%s3654_s5 + $0x30] sm:$0xff]  ;;  %v1274_v32 = vld [vmem:[%s3656_s7 + $0x3c8] sm:$0xff] }
 0x535   : >> { %v842_v53 = vmul.f32 %v2243_v21, %v841_v52  ;;  %v945_v21 = vld [vmem:[%s3654_s5 + $0x198] sm:$0xff] }
 0x536   : >> { %1031 = vmatpush.msra.mxu2 %v945_v21  ;;  %v1110_v52 = vld [vmem:[%s3654_s5 + $0x38] sm:$0xff] }
 0x537   : >> { %2138 = vmatmul.msk.f32.vlgmr.msra.gmra.mxu0 %vm485_vm3, %v842_v53  ;;  %v1228_v21 = vld [vmem:[%s3656_s7 + $0x258] sm:$0xff] }
 0x538   : >> { %1032 = vmatpush.msra.mxu2 %v941_v25  ;;  %1185 = vmatpush.msra.mxu0 %v1121_v37  ;;  %v1227_v25 = vld [vmem:[%s3656_s7 + $0x250] sm:$0xff]  ;;  %v1273_v37 = vld [vmem:[%s3656_s7 + $0x3c0] sm:$0xff] }
 0x53a   : >> { %1033 = vmatpush.msra.mxu2 %v937_v29  ;;  %1186 = vmatpush.msra.mxu0 %v1117_v42  ;;  %v1226_v29 = vld [vmem:[%s3656_s7 + $0x248] sm:$0xff]  ;;  %v1223_v42 = vld [vmem:[%s3656_s7 + $0x230] sm:$0xff] }
 0x53b   : >> { %v638_v54 = vpop.f32.mrf.mxu2 }
 0x53c   : >> { %2130 = vmatmul.msk.f32.vlgmr.msrb.gmra.mxu1 %vm485_vm3, %v638_v54  ;;  %1034 = vmatpush.msra.mxu2 %v933_v33  ;;  %v1225_v33 = vld [vmem:[%s3656_s7 + $0x240] sm:$0xff] }
 0x53d   : >> { %971 = vmatpush.msrb.mxu1 %v942_v19  ;;  %1187 = vmatpush.msra.mxu0 %v1113_v46  ;;  %v1245_v19 = vld [vmem:[%s3656_s7 + $0x2e0] sm:$0xff]  ;;  %v1254_v46 = vld [vmem:[%s3656_s7 + $0x328] sm:$0xff] }
 0x53f   : >> { %972 = vmatpush.msrb.mxu1 %v938_v23  ;;  %1188 = vmatpush.msra.mxu0 %v1109_v51  ;;  %v1244_v23 = vld [vmem:[%s3656_s7 + $0x2d8] sm:$0xff]  ;;  %v1237_v51 = vld [vmem:[%s3656_s7 + $0x2a0] sm:$0xff] }
 0x541   : >> { %973 = vmatpush.msrb.mxu1 %v934_v27  ;;  %v1243_v27 = vld [vmem:[%s3656_s7 + $0x2d0] sm:$0xff] }
 0x543   : >> { %v763_v55 = vpop.f32.mrf.mxu2  ;;  %974 = vmatpush.msrb.mxu1 %v930_v31  ;;  %v1242_v31 = vld [vmem:[%s3656_s7 + $0x2c8] sm:$0xff] }
 0x544   : >> { %2135 = vmatmul.msk.f32.vlgmr.msra.gmra.mxu1 %vm485_vm3, %v763_v55 }
 0x545   : >> { %1145 = vmatpush.msra.mxu1 %v1119_v36  ;;  %v1241_v36 = vld [vmem:[%s3656_s7 + $0x2c0] sm:$0xff] }
 0x547   : >> { %1146 = vmatpush.msra.mxu1 %v1115_v40  ;;  %v1240_v40 = vld [vmem:[%s3656_s7 + $0x2b8] sm:$0xff] }
 0x549   : >> { %1147 = vmatpush.msra.mxu1 %v1111_v45  ;;  %v1222_v45 = vld [vmem:[%s3656_s7 + $0x228] sm:$0xff] }
 0x54b   : >> { %1148 = vmatpush.msra.mxu1 %v1107_v49  ;;  %v1221_v49 = vld [vmem:[%s3656_s7 + $0x220] sm:$0xff] }
 0x5b4   : >> { %v866_v56 = vpop.f32.mrf.mxu0 }
 0x5b5   : >> { %2139 = vmatmul.msk.f32.vlgmr.msrb.gmra.mxu2 %vm485_vm3, %v866_v56  ;;  %vm905_vm3 = vweird.f32 %v2247_v9 }
 0x5b6   : >> { %1205 = vmatpush.msrb.mxu2 %v1122_v38  ;;  %v1224_v38 = vld [vmem:[%s3656_s7 + $0x238] sm:$0xff] }
 0x5b8   : >> { %1206 = vmatpush.msrb.mxu2 %v1118_v43  ;;  %v1255_v43 = vld [vmem:[%s3656_s7 + $0x330] sm:$0xff] }
 0x5b9   : >> { %v662_v57 = vpop.f32.mrf.mxu1 }
 0x5ba   : >> { %v686_v59 = vadd.f32 %v2536_v1, %v662_v57  ;;  %v2561_v1 = vsel %vm905_vm3, %v2247_v9, %v904_v13  ;;  %1207 = vmatpush.msrb.mxu2 %v1114_v47  ;;  %v1280_v9 = vld [vmem:[%s3656_s7 + $0x3f8] sm:$0xff]  ;;  %v1279_v13 = vld [vmem:[%s3656_s7 + $0x3f0] sm:$0xff]  ;;  %v1238_v47 = vld [vmem:[%s3656_s7 + $0x2a8] sm:$0xff] }
 0x5bc   : >> { %1208 = vmatpush.msrb.mxu2 %v1110_v52  ;;  %v1269_v52 = vld [vmem:[%s3656_s7 + $0x3a0] sm:$0xff] }
 0x5c1   : >> { %v787_v58 = vpop.f32.mrf.mxu1 }
 0x5c2   : >> { %v790_v60 = vadd.f32 %v787_v58, %v686_v59  ;;  %v926_v59 = vperm.slane %v2482_v4, 5 }
 0x638   : >> { %v890_v62 = vpop.f32.mrf.mxu2 }
 0x639   : >> { %v893_v63 = vadd.f32 %v890_v62, %v790_v60 }
 0x63b   : >> { %v895_v2 = vadd.f32 %v894_v61, %v893_v63  ;;  %v928_v61 = vperm.slane %v2482_v4, 6 }
 0x63d   : >> { %v896_v5 = vadd.f32 %v2328_v7, %v895_v2 }
 0x63f   : >> { %v897_v6 = vsel %vm444_vm2, %v896_v5, 0.0 }
 0x640   : >> { %898 = vadd.xlane.f32.xlu0 %v897_v6  ;;  %v1264_v6 = vld [vmem:[%s3656_s7 + $0x378] sm:$0xff] }
 0x6b3   : >> { %v899_v14 = vpop.xlane.xlu0 %898 }
 0x6b4   : >> { %v907_v15 = vmul.f32 %v2561_v1, %v899_v14  ;;  %v1230_v14 = vld [vmem:[%s3656_s7 + $0x268] sm:$0xff] }
 0x6b6   : >> { %v2564_v16 = vsub.f32 %v896_v5, %v907_v15  ;;  %v1232_v5 = vld [vmem:[%s3656_s7 + $0x278] sm:$0xff]  ;;  %v1262_v15 = vld [vmem:[%s3656_s7 + $0x368] sm:$0xff] }
 0x6b8   : >> { %v909_v7 = vmul.f32 %v2564_v16, %v2564_v16 }
 0x6ba   : >> { %v910_v17 = vsel %vm444_vm2, %v909_v7, 0.0  ;;  %v1278_v7 = vld [vmem:[%s3656_s7 + $0x3e8] sm:$0xff] }
 0x6bb   : >> { %911 = vadd.xlane.f32.xlu1 %v910_v17  ;;  %v1229_v17 = vld [vmem:[%s3656_s7 + $0x260] sm:$0xff] }
 0x72e   : >> { %v912_v41 = vpop.xlane.xlu1 %911 }
 0x72f   : >> { %v913_v34 = vmul.f32 %v912_v41, %v2561_v1  ;;  %v1272_v41 = vld [vmem:[%s3656_s7 + $0x3b8] sm:$0xff] }
 0x731   : >> { %v914_v50 = vadd.f32 1e-05, %v913_v34  ;;  %v1271_v34 = vld [vmem:[%s3656_s7 + $0x3b0] sm:$0xff] }
 0x733   : >> { %2248 = vrsqrt.f32 %v914_v50  ;;  %vm921_vm7 = vweird.f32 %v914_v50 }
 0x739   : >> { %v2249_v53 = vpop.eup %2248 }
 0x73a   : >> { %v916_v54 = vmul.f32 %v2249_v53, %v914_v50  ;;  %vm922_vm6 = vweird.f32 %v2249_v53  ;;  %v1253_v50 = vld [vmem:[%s3656_s7 + $0x320] sm:$0xff] }
 0x73b   : >> { %vm923_vm8 = vmor %vm921_vm7, %vm922_vm6 }
 0x73c   : >> { %v917_v55 = vmul.f32 %v2249_v53, %v916_v54  ;;  %v1252_v54 = vld [vmem:[%s3656_s7 + $0x318] sm:$0xff] }
 0x73e   : >> { %v918_v56 = vmul.f32 0.5, %v917_v55  ;;  %v1236_v55 = vld [vmem:[%s3656_s7 + $0x298] sm:$0xff] }
 0x740   : >> { %v919_v57 = vsub.f32 1.5, %v918_v56  ;;  %v1268_v56 = vld [vmem:[%s3656_s7 + $0x398] sm:$0xff] }
 0x742   : >> { %v920_v58 = vmul.f32 %v2249_v53, %v919_v57  ;;  %v1219_v57 = vld [vmem:[%s3656_s7 + $0x210] sm:$0xff] }
 0x744   : >> { %v924_v60 = vsel %vm923_vm8, %v2249_v53, %v920_v58  ;;  %v1220_v53 = vld [vmem:[%s3656_s7 + $0x218] sm:$0xff]  ;;  %v1251_v58 = vld [vmem:[%s3656_s7 + $0x310] sm:$0xff] }
 0x745   : >> { %v925_v62 = vmul.f32 %v924_v60, %v2564_v16  ;;  %v1246_v16 = vld [vmem:[%s3656_s7 + $0x2e8] sm:$0xff]  ;;  %v1267_v60 = vld [vmem:[%s3656_s7 + $0x390] sm:$0xff] }
 0x747   : >> { %v927_v63 = vmul.f32 %v926_v59, %v925_v62  ;;  %v1235_v59 = vld [vmem:[%s3656_s7 + $0x290] sm:$0xff]  ;;  %v1250_v62 = vld [vmem:[%s3656_s7 + $0x308] sm:$0xff] }
 0x749   : >> { %v2669_v2 = vadd.f32 %v928_v61, %v927_v63  ;;  %v1218_v61 = vld [vmem:[%s3656_s7 + $0x208] sm:$0xff] }
 0x74a   : >> { %v1234_v63 = vld [vmem:[%s3656_s7 + $0x288] sm:$0xff] }
 0x74b   : >> { %2140 = vmatmul.msk.f32.vlgmr.msrb.gmra.mxu1 %vm444_vm2, %v2669_v2  ;;  %2141 = vmatmul.msk.f32.vlgmr.msrb.gmra.mxu3 %vm444_vm2, %v2669_v2 }
 0x74c   : >> { %2142 = vmatmul.msk.f32.vlgmr.msrb.gmra.mxu0 %vm444_vm2, %v2669_v2  ;;  %2143 = vmatmul.msk.f32.vlgmr.msra.gmra.mxu2 %vm444_vm2, %v2669_v2 }
 0x74d   : >> { %1281 = vmatpush.msrb.mxu1 %v1232_v5  ;;  %1321 = vmatpush.msrb.mxu0 %v1264_v6  ;;  %v1266_v5 = vld [vmem:[%s3656_s7 + $0x388] sm:$0xff]  ;;  %v1217_v6 = vld [vmem:[%s3656_s7 + $0x200] sm:$0xff] }
 0x74e   : >> { %1301 = vmatpush.msrb.mxu3 %v1248_v8  ;;  %1341 = vmatpush.msra.mxu2 %v1280_v9  ;;  %v1249_v8 = vld [vmem:[%s3656_s7 + $0x300] sm:$0xff]  ;;  %v1058_v9 = vld [vmem:[%s3656_s7 + $0x78] sm:$0xff] }
 0x74f   : >> { %1282 = vmatpush.msrb.mxu1 %v1231_v10  ;;  %1322 = vmatpush.msrb.mxu0 %v1263_v11  ;;  %v1090_v10 = vld [vmem:[%s3656_s7 + $0x178] sm:$0xff]  ;;  %v1233_v11 = vld [vmem:[%s3656_s7 + $0x280] sm:$0xff] }
 0x750   : >> { %1302 = vmatpush.msrb.mxu3 %v1247_v12  ;;  %1342 = vmatpush.msra.mxu2 %v1279_v13  ;;  %v1265_v12 = vld [vmem:[%s3656_s7 + $0x380] sm:$0xff]  ;;  %v1057_v13 = vld [vmem:[%s3656_s7 + $0x70] sm:$0xff] }
 0x751   : >> { %1283 = vmatpush.msrb.mxu1 %v1230_v14  ;;  %1323 = vmatpush.msrb.mxu0 %v1262_v15  ;;  %v1089_v14 = vld [vmem:[%s3656_s7 + $0x170] sm:$0xff]  ;;  %v1074_v15 = vld [vmem:[%s3656_s7 + $0xf8] sm:$0xff] }
 0x752   : >> { %1303 = vmatpush.msrb.mxu3 %v1246_v16  ;;  %1343 = vmatpush.msra.mxu2 %v1278_v7  ;;  %v1106_v16 = vld [vmem:[%s3656_s7 + $0x1f8] sm:$0xff]  ;;  %v1056_v7 = vld [vmem:[%s3656_s7 + $0x68] sm:$0xff] }
 0x753   : >> { %2144 = vmatmul.msk.f32.vlgmr.msra.gmra.mxu1 %vm444_vm2, %v2669_v2  ;;  %2145 = vmatmul.msk.f32.vlgmr.msra.gmra.mxu3 %vm444_vm2, %v2669_v2 }
 0x754   : >> { %2146 = vmatmul.msk.f32.vlgmr.msra.gmra.mxu0 %vm444_vm2, %v2669_v2  ;;  %2147 = vmatmul.msk.f32.vlgmr.msrb.gmra.mxu2 %vm444_vm2, %v2669_v2 }
 0x755   : >> { %1284 = vmatpush.msrb.mxu1 %v1229_v17  ;;  %1324 = vmatpush.msrb.mxu0 %v1261_v18  ;;  %v1088_v17 = vld [vmem:[%s3656_s7 + $0x168] sm:$0xff]  ;;  %v1073_v18 = vld [vmem:[%s3656_s7 + $0xf0] sm:$0xff] }
 0x756   : >> { %1304 = vmatpush.msrb.mxu3 %v1245_v19  ;;  %1344 = vmatpush.msra.mxu2 %v1277_v20  ;;  %v1105_v19 = vld [vmem:[%s3656_s7 + $0x1f0] sm:$0xff]  ;;  %v1055_v20 = vld [vmem:[%s3656_s7 + $0x60] sm:$0xff] }
 0x757   : >> { %1285 = vmatpush.msrb.mxu1 %v1228_v21  ;;  %1325 = vmatpush.msrb.mxu0 %v1260_v22  ;;  %v1087_v21 = vld [vmem:[%s3656_s7 + $0x160] sm:$0xff]  ;;  %v1054_v22 = vld [vmem:[%s3656_s7 + $0x58] sm:$0xff] }
 0x758   : >> { %1305 = vmatpush.msrb.mxu3 %v1244_v23  ;;  %1345 = vmatpush.msra.mxu2 %v1276_v24  ;;  %v1086_v23 = vld [vmem:[%s3656_s7 + $0x158] sm:$0xff]  ;;  %v1053_v24 = vld [vmem:[%s3656_s7 + $0x50] sm:$0xff] }
 0x759   : >> { %1286 = vmatpush.msrb.mxu1 %v1227_v25  ;;  %1326 = vmatpush.msrb.mxu0 %v1259_v26  ;;  %v1072_v25 = vld [vmem:[%s3656_s7 + $0xe8] sm:$0xff]  ;;  %v1085_v26 = vld [vmem:[%s3656_s7 + $0x150] sm:$0xff] }
 0x75a   : >> { %1306 = vmatpush.msrb.mxu3 %v1243_v27  ;;  %1346 = vmatpush.msra.mxu2 %v1275_v28  ;;  %v1104_v27 = vld [vmem:[%s3656_s7 + $0x1e8] sm:$0xff] }
 0x75b   : >> { %1287 = vmatpush.msrb.mxu1 %v1226_v29  ;;  %1327 = vmatpush.msrb.mxu0 %v1258_v30  ;;  %v1052_v28 = vld [vmem:[%s3656_s7 + $0x48] sm:$0xff]  ;;  %v1071_v29 = vld [vmem:[%s3656_s7 + $0xe0] sm:$0xff] }
 0x75c   : >> { %1307 = vmatpush.msrb.mxu3 %v1242_v31  ;;  %1347 = vmatpush.msra.mxu2 %v1274_v32  ;;  %v1084_v30 = vld [vmem:[%s3656_s7 + $0x148] sm:$0xff]  ;;  %v1103_v31 = vld [vmem:[%s3656_s7 + $0x1e0] sm:$0xff] }
 0x75d   : >> { %1288 = vmatpush.msrb.mxu1 %v1225_v33  ;;  %1328 = vmatpush.msrb.mxu0 %v1257_v35  ;;  %v1051_v32 = vld [vmem:[%s3656_s7 + $0x40] sm:$0xff]  ;;  %v1070_v33 = vld [vmem:[%s3656_s7 + $0xd8] sm:$0xff] }
 0x75e   : >> { %1308 = vmatpush.msrb.mxu3 %v1241_v36  ;;  %1348 = vmatpush.msra.mxu2 %v1273_v37  ;;  %v1083_v35 = vld [vmem:[%s3656_s7 + $0x140] sm:$0xff]  ;;  %v1102_v36 = vld [vmem:[%s3656_s7 + $0x1d8] sm:$0xff] }
 0x75f   : >> { %1289 = vmatpush.msrb.mxu1 %v1224_v38  ;;  %1329 = vmatpush.msrb.mxu0 %v1256_v39  ;;  %v1050_v37 = vld [vmem:[%s3656_s7 + $0x38] sm:$0xff]  ;;  %v1069_v38 = vld [vmem:[%s3656_s7 + $0xd0] sm:$0xff] }
 0x760   : >> { %1309 = vmatpush.msrb.mxu3 %v1240_v40  ;;  %1349 = vmatpush.msra.mxu2 %v1272_v41  ;;  %v1082_v39 = vld [vmem:[%s3656_s7 + $0x138] sm:$0xff]  ;;  %v1101_v40 = vld [vmem:[%s3656_s7 + $0x1d0] sm:$0xff] }
 0x761   : >> { %1290 = vmatpush.msrb.mxu1 %v1223_v42  ;;  %1330 = vmatpush.msrb.mxu0 %v1255_v43  ;;  %v1049_v41 = vld [vmem:[%s3656_s7 + $0x30] sm:$0xff]  ;;  %v1068_v42 = vld [vmem:[%s3656_s7 + $0xc8] sm:$0xff] }
 0x762   : >> { %1310 = vmatpush.msrb.mxu3 %v1239_v44  ;;  %1350 = vmatpush.msra.mxu2 %v1271_v34  ;;  %v1081_v43 = vld [vmem:[%s3656_s7 + $0x130] sm:$0xff]  ;;  %v1100_v44 = vld [vmem:[%s3656_s7 + $0x1c8] sm:$0xff] }
 0x763   : >> { %1291 = vmatpush.msrb.mxu1 %v1222_v45  ;;  %1331 = vmatpush.msrb.mxu0 %v1254_v46  ;;  %v1048_v34 = vld [vmem:[%s3656_s7 + $0x28] sm:$0xff]  ;;  %v1067_v45 = vld [vmem:[%s3656_s7 + $0xc0] sm:$0xff] }
 0x764   : >> { %1311 = vmatpush.msrb.mxu3 %v1238_v47  ;;  %1351 = vmatpush.msra.mxu2 %v1270_v48  ;;  %v1080_v46 = vld [vmem:[%s3656_s7 + $0x128] sm:$0xff]  ;;  %v1099_v47 = vld [vmem:[%s3656_s7 + $0x1c0] sm:$0xff] }
 0x765   : >> { %1292 = vmatpush.msrb.mxu1 %v1221_v49  ;;  %1332 = vmatpush.msrb.mxu0 %v1253_v50  ;;  %v1047_v48 = vld [vmem:[%s3656_s7 + $0x20] sm:$0xff]  ;;  %v1066_v49 = vld [vmem:[%s3656_s7 + $0xb8] sm:$0xff] }
 0x766   : >> { %1312 = vmatpush.msrb.mxu3 %v1237_v51  ;;  %1352 = vmatpush.msra.mxu2 %v1269_v52  ;;  %v1079_v50 = vld [vmem:[%s3656_s7 + $0x120] sm:$0xff]  ;;  %v1098_v51 = vld [vmem:[%s3656_s7 + $0x1b8] sm:$0xff] }
 0x767   : >> { %1293 = vmatpush.msrb.mxu1 %v1220_v53  ;;  %1333 = vmatpush.msrb.mxu0 %v1252_v54  ;;  %v1046_v52 = vld [vmem:[%s3656_s7 + $0x18] sm:$0xff]  ;;  %v1065_v53 = vld [vmem:[%s3656_s7 + $0xb0] sm:$0xff] }
 0x768   : >> { %1313 = vmatpush.msrb.mxu3 %v1236_v55  ;;  %1353 = vmatpush.msra.mxu2 %v1268_v56  ;;  %v1078_v54 = vld [vmem:[%s3656_s7 + $0x118] sm:$0xff]  ;;  %v1097_v55 = vld [vmem:[%s3656_s7 + $0x1b0] sm:$0xff] }
 0x769   : >> { %1294 = vmatpush.msrb.mxu1 %v1219_v57  ;;  %1334 = vmatpush.msrb.mxu0 %v1251_v58  ;;  %v1045_v56 = vld [vmem:[%s3656_s7 + $0x10] sm:$0xff]  ;;  %v1064_v57 = vld [vmem:[%s3656_s7 + $0xa8] sm:$0xff] }
 0x76a   : >> { %1314 = vmatpush.msrb.mxu3 %v1235_v59  ;;  %1354 = vmatpush.msra.mxu2 %v1267_v60  ;;  %v1077_v58 = vld [vmem:[%s3656_s7 + $0x110] sm:$0xff]  ;;  %v1096_v59 = vld [vmem:[%s3656_s7 + $0x1a8] sm:$0xff] }
 0x76b   : >> { %1295 = vmatpush.msrb.mxu1 %v1218_v61  ;;  %1335 = vmatpush.msrb.mxu0 %v1250_v62  ;;  %v1044_v60 = vld [vmem:[%s3656_s7 + $0x8] sm:$0xff]  ;;  %v1063_v61 = vld [vmem:[%s3656_s7 + $0xa0] sm:$0xff] }
 0x76c   : >> { %1315 = vmatpush.msrb.mxu3 %v1234_v63  ;;  %1355 = vmatpush.msra.mxu2 %v1266_v5  ;;  %v1076_v62 = vld [vmem:[%s3656_s7 + $0x108] sm:$0xff]  ;;  %v1095_v63 = vld [vmem:[%s3656_s7 + $0x1a0] sm:$0xff] }
 0x76d   : >> { %1296 = vmatpush.msrb.mxu1 %v1217_v6  ;;  %1336 = vmatpush.msrb.mxu0 %v1249_v8  ;;  %v1043_v5 = vld [vmem:[%s3656_s7] sm:$0xff]  ;;  %v1062_v6 = vld [vmem:[%s3656_s7 + $0x98] sm:$0xff] }
 0x76e   : >> { %1316 = vmatpush.msrb.mxu3 %v1233_v11  ;;  %1356 = vmatpush.msra.mxu2 %v1265_v12  ;;  %v1075_v8 = vld [vmem:[%s3656_s7 + $0x100] sm:$0xff]  ;;  %v1093_v11 = vld [vmem:[%s3656_s7 + $0x190] sm:$0xff]  ;;  %v1060_v12 = vld [vmem:[%s3656_s7 + $0x88] sm:$0xff] }
 0x76f   : >> { %1361 = vmatpush.msra.mxu1 %v1058_v9  ;;  %1401 = vmatpush.msra.mxu0 %v1090_v10  ;;  %v1094_v9 = vld [vmem:[%s3656_s7 + $0x198] sm:$0xff]  ;;  %v1061_v10 = vld [vmem:[%s3656_s7 + $0x90] sm:$0xff] }
 0x770   : >> { %1381 = vmatpush.msra.mxu3 %v1074_v15  ;;  %1421 = vmatpush.msrb.mxu2 %v1106_v16  ;;  %v1091_v15 = vld [vmem:[%s3656_s7 + $0x180] sm:$0xff] }
 0x771   : >> { %1362 = vmatpush.msra.mxu1 %v1057_v13  ;;  %1402 = vmatpush.msra.mxu0 %v1089_v14  ;;  %v1092_v13 = vld [vmem:[%s3656_s7 + $0x188] sm:$0xff]  ;;  %v1059_v14 = vld [vmem:[%s3656_s7 + $0x80] sm:$0xff] }
 0x772   : >> { %1382 = vmatpush.msra.mxu3 %v1073_v18  ;;  %1422 = vmatpush.msrb.mxu2 %v1105_v19 }
 0x773   : >> { %1363 = vmatpush.msra.mxu1 %v1056_v7  ;;  %1403 = vmatpush.msra.mxu0 %v1088_v17  ;;  %v1123_v17 = vld [vmem:[%s3655_s6 + $0x4] sm:$0xf] }
 0x774   : >> { %1383 = vmatpush.msra.mxu3 %v1072_v25  ;;  %1423 = vmatpush.msrb.mxu2 %v1104_v27  ;;  %v1125_v18 = vperm.slane %v1123_v17, 0 }
 0x775   : >> { %1364 = vmatpush.msra.mxu1 %v1055_v20  ;;  %1404 = vmatpush.msra.mxu0 %v1087_v21  ;;  %v1127_v20 = vperm.slane %v1123_v17, 2 }
 0x776   : >> { %1384 = vmatpush.msra.mxu3 %v1071_v29  ;;  %1424 = vmatpush.msrb.mxu2 %v1103_v31  ;;  %v1126_v29 = vperm.slane %v1123_v17, 1 }
 0x777   : >> { %1365 = vmatpush.msra.mxu1 %v1054_v22  ;;  %1405 = vmatpush.msra.mxu0 %v1086_v23  ;;  %v946_v22 = vld [vmem:[%s3655_s6] sm:$0xf] }
 0x778   : >> { %1385 = vmatpush.msra.mxu3 %v1070_v33  ;;  %1425 = vmatpush.msrb.mxu2 %v1102_v36  ;;  %v948_v27 = vperm.slane %v946_v22, 0  ;;  %v950_v31 = vperm.slane %v946_v22, 2  ;;  %v1128_v33 = vperm.slane %v1123_v17, 3  ;;  %v1449_v36 = vld [vmem:[%s3654_s5 + $0x140] sm:$0xff]  ;;  %v1593_v17 = vld [vmem:[%s3656_s7 + $0x550] sm:$0xff] }
 0x779   : >> { %1366 = vmatpush.msra.mxu1 %v1053_v24  ;;  %1406 = vmatpush.msra.mxu0 %v1085_v26 }
 0x77a   : >> { %1386 = vmatpush.msra.mxu3 %v1069_v38  ;;  %1426 = vmatpush.msrb.mxu2 %v1101_v40  ;;  %v1451_v38 = vld [vmem:[%s3654_s5 + $0x150] sm:$0xff] }
 0x77b   : >> { %1367 = vmatpush.msra.mxu1 %v1052_v28  ;;  %1407 = vmatpush.msra.mxu0 %v1084_v30  ;;  %v1453_v30 = vld [vmem:[%s3654_s5 + $0x1c0] sm:$0xff] }
 0x77c   : >> { %1387 = vmatpush.msra.mxu3 %v1068_v42  ;;  %1427 = vmatpush.msrb.mxu2 %v1100_v44  ;;  %v1445_v42 = vld [vmem:[%s3654_s5 + $0xc0] sm:$0xff] }
 0x77d   : >> { %1368 = vmatpush.msra.mxu1 %v1051_v32  ;;  %1408 = vmatpush.msra.mxu0 %v1083_v35  ;;  %v1455_v35 = vld [vmem:[%s3654_s5 + $0x1d0] sm:$0xff] }
 0x77e   : >> { %1388 = vmatpush.msra.mxu3 %v1067_v45  ;;  %1428 = vmatpush.msrb.mxu2 %v1099_v47  ;;  %v949_v45 = vperm.slane %v946_v22, 1  ;;  %v1454_v47 = vld [vmem:[%s3654_s5 + $0x1c8] sm:$0xff] }
 0x77f   : >> { %1369 = vmatpush.msra.mxu1 %v1050_v37  ;;  %1409 = vmatpush.msra.mxu0 %v1082_v39 }
 0x780   : >> { %1389 = vmatpush.msra.mxu3 %v1066_v49  ;;  %1429 = vmatpush.msrb.mxu2 %v1098_v51 }
 0x781   : >> { %1370 = vmatpush.msra.mxu1 %v1049_v41  ;;  %1410 = vmatpush.msra.mxu0 %v1081_v43 }
 0x782   : >> { %1390 = vmatpush.msra.mxu3 %v1065_v53  ;;  %1430 = vmatpush.msrb.mxu2 %v1097_v55  ;;  %v1450_v55 = vld [vmem:[%s3654_s5 + $0x148] sm:$0xff] }
 0x783   : >> { %1371 = vmatpush.msra.mxu1 %v1048_v34  ;;  %1411 = vmatpush.msra.mxu0 %v1080_v46  ;;  %v1447_v34 = vld [vmem:[%s3654_s5 + $0xd0] sm:$0xff] }
 0x784   : >> { %1391 = vmatpush.msra.mxu3 %v1064_v57  ;;  %1431 = vmatpush.msrb.mxu2 %v1096_v59  ;;  %v1566_v57 = vld [vmem:[%s3656_s7 + $0x478] sm:$0xff] }
 0x785   : >> { %1372 = vmatpush.msra.mxu1 %v1047_v48  ;;  %1412 = vmatpush.msra.mxu0 %v1079_v50  ;;  %v951_v48 = vperm.slane %v946_v22, 3  ;;  %v1443_v50 = vld [vmem:[%s3654_s5 + $0x50] sm:$0xff]  ;;  %v1559_v22 = vld [vmem:[%s3656_s7 + $0x440] sm:$0xff] }
 0x786   : >> { %1392 = vmatpush.msra.mxu3 %v1063_v61  ;;  %1432 = vmatpush.msrb.mxu2 %v1095_v63  ;;  %v1446_v61 = vld [vmem:[%s3654_s5 + $0xc8] sm:$0xff]  ;;  %v1597_v63 = vld [vmem:[%s3656_s7 + $0x570] sm:$0xff] }
 0x787   : >> { %1373 = vmatpush.msra.mxu1 %v1046_v52  ;;  %1413 = vmatpush.msra.mxu0 %v1078_v54  ;;  %v1441_v52 = vld [vmem:[%s3654_s5 + $0x40] sm:$0xff]  ;;  %v1456_v54 = vld [vmem:[%s3654_s5 + $0x1d8] sm:$0xff] }
 0x788   : >> { %1393 = vmatpush.msra.mxu3 %v1062_v6  ;;  %1433 = vmatpush.msrb.mxu2 %v1094_v9 }
 0x789   : >> { %1374 = vmatpush.msra.mxu1 %v1045_v56  ;;  %1414 = vmatpush.msra.mxu0 %v1077_v58  ;;  %v1598_v58 = vld [vmem:[%s3656_s7 + $0x578] sm:$0xff] }
 0x78a   : >> { %1394 = vmatpush.msra.mxu3 %v1061_v10  ;;  %1434 = vmatpush.msrb.mxu2 %v1093_v11  ;;  %v1444_v10 = vld [vmem:[%s3654_s5 + $0x58] sm:$0xff]  ;;  %v1564_v11 = vld [vmem:[%s3656_s7 + $0x468] sm:$0xff] }
 0x78b   : >> { %1375 = vmatpush.msra.mxu1 %v1044_v60  ;;  %1415 = vmatpush.msra.mxu0 %v1076_v62  ;;  %v1452_v60 = vld [vmem:[%s3654_s5 + $0x158] sm:$0xff]  ;;  %v1565_v62 = vld [vmem:[%s3656_s7 + $0x470] sm:$0xff] }
 0x78c   : >> { %1395 = vmatpush.msra.mxu3 %v1060_v12  ;;  %1435 = vmatpush.msrb.mxu2 %v1092_v13  ;;  %v1596_v12 = vld [vmem:[%s3656_s7 + $0x568] sm:$0xff]  ;;  %v1563_v13 = vld [vmem:[%s3656_s7 + $0x460] sm:$0xff] }
 0x78d   : >> { %1376 = vmatpush.msra.mxu1 %v1043_v5  ;;  %1416 = vmatpush.msra.mxu0 %v1075_v8  ;;  %v1448_v5 = vld [vmem:[%s3654_s5 + $0xd8] sm:$0xff]  ;;  %v1442_v8 = vld [vmem:[%s3654_s5 + $0x48] sm:$0xff] }
 0x78e   : >> { %1396 = vmatpush.msra.mxu3 %v1059_v14  ;;  %1436 = vmatpush.msrb.mxu2 %v1091_v15  ;;  %v1595_v14 = vld [vmem:[%s3656_s7 + $0x560] sm:$0xff]  ;;  %v1562_v15 = vld [vmem:[%s3656_s7 + $0x458] sm:$0xff] }
 0x7c8   : >> { %v976_v16 = vpop.f32.mrf.mxu1 }
 0x7c9   : >> { %v1016_v7 = vpop.f32.mrf.mxu0  ;;  %v977_v39 = vadd.f32 %v976_v16, %v948_v27  ;;  %v1594_v16 = vld [vmem:[%s3656_s7 + $0x558] sm:$0xff]  ;;  %v1580_v27 = vld [vmem:[%s3656_s7 + $0x4e8] sm:$0xff] }
 0x7ca   : >> { %v1017_v43 = vadd.f32 %v1016_v7, %v950_v31  ;;  %v1561_v7 = vld [vmem:[%s3656_s7 + $0x450] sm:$0xff]  ;;  %v1579_v31 = vld [vmem:[%s3656_s7 + $0x4e0] sm:$0xff] }
 0x7cb   : >> { %v1039_v51 = vmax.f32 %v977_v39, 0.0  ;;  %v1555_v39 = vld [vmem:[%s3656_s7 + $0x420] sm:$0xff] }
 0x7cc   : >> { %v1041_v53 = vmax.f32 %v1017_v43, 0.0  ;;  %v1554_v43 = vld [vmem:[%s3656_s7 + $0x418] sm:$0xff] }
 0x7ce   : >> { %v996_v19 = vpop.f32.mrf.mxu3 }
 0x7cf   : >> { %v1036_v21 = vpop.f32.mrf.mxu2  ;;  %v997_v56 = vadd.f32 %v996_v19, %v949_v45  ;;  %v1582_v19 = vld [vmem:[%s3656_s7 + $0x4f8] sm:$0xff]  ;;  %v1608_v45 = vld [vmem:[%s3656_s7 + $0x5c8] sm:$0xff] }
 0x7d0   : >> { %v1150_v23 = vpop.f32.mrf.mxu1  ;;  %v1037_v59 = vadd.f32 %v1036_v21, %v951_v48  ;;  %v1614_v21 = vld [vmem:[%s3656_s7 + $0x5f8] sm:$0xff]  ;;  %v1585_v48 = vld [vmem:[%s3656_s7 + $0x510] sm:$0xff] }
 0x7d1   : >> { %v1151_v24 = vadd.f32 %v1150_v23, %v1125_v18  ;;  %v1190_v25 = vpop.f32.mrf.mxu0  ;;  %v1040_v6 = vmax.f32 %v997_v56, 0.0  ;;  %v1560_v18 = vld [vmem:[%s3656_s7 + $0x448] sm:$0xff]  ;;  %v1581_v23 = vld [vmem:[%s3656_s7 + $0x4f0] sm:$0xff]  ;;  %v1583_v56 = vld [vmem:[%s3656_s7 + $0x500] sm:$0xff] }
 0x7d2   : >> { %v1191_v26 = vadd.f32 %v1190_v25, %v1127_v20  ;;  %v1042_v9 = vmax.f32 %v1037_v59, 0.0  ;;  %v1592_v20 = vld [vmem:[%s3656_s7 + $0x548] sm:$0xff]  ;;  %v1613_v25 = vld [vmem:[%s3656_s7 + $0x5f0] sm:$0xff] }
 0x7d3   : >> { %v1213_v28 = vmax.f32 %v1151_v24, 0.0  ;;  %v1591_v24 = vld [vmem:[%s3656_s7 + $0x540] sm:$0xff]  ;;  %v1604_v59 = vld [vmem:[%s3656_s7 + $0x5a8] sm:$0xff] }
 0x7d4   : >> { %v1215_v32 = vmax.f32 %v1191_v26, 0.0  ;;  %v1558_v26 = vld [vmem:[%s3656_s7 + $0x438] sm:$0xff] }
 0x7d5   : >> { %1297 = vmatmul.f32.vlgmr.msrb.gmra.mxu1 %v1213_v28  ;;  %v1590_v28 = vld [vmem:[%s3656_s7 + $0x538] sm:$0xff] }
 0x7d6   : >> { %1337 = vmatmul.f32.vlgmr.msrb.gmra.mxu0 %v1215_v32  ;;  %v1170_v37 = vpop.f32.mrf.mxu3  ;;  %1479 = vmatpush.msrb.mxu1 %v1453_v30  ;;  %v1557_v30 = vld [vmem:[%s3656_s7 + $0x430] sm:$0xff] }
 0x7d7   : >> { %v1171_v40 = vadd.f32 %v1170_v37, %v1126_v29  ;;  %v1210_v41 = vpop.f32.mrf.mxu2  ;;  %1519 = vmatpush.msrb.mxu0 %v1455_v35  ;;  %v1612_v29 = vld [vmem:[%s3656_s7 + $0x5e8] sm:$0xff]  ;;  %v1589_v32 = vld [vmem:[%s3656_s7 + $0x530] sm:$0xff] }
 0x7d8   : >> { %v1211_v44 = vadd.f32 %v1210_v41, %v1128_v33  ;;  %1480 = vmatpush.msrb.mxu1 %v1449_v36  ;;  %v1611_v33 = vld [vmem:[%s3656_s7 + $0x5e0] sm:$0xff]  ;;  %v1556_v35 = vld [vmem:[%s3656_s7 + $0x428] sm:$0xff]  ;;  %v1578_v36 = vld [vmem:[%s3656_s7 + $0x4d8] sm:$0xff] }
 0x7d9   : >> { %v1214_v46 = vmax.f32 %v1171_v40, 0.0  ;;  %1520 = vmatpush.msrb.mxu0 %v1451_v38  ;;  %v1588_v37 = vld [vmem:[%s3656_s7 + $0x528] sm:$0xff]  ;;  %v1610_v38 = vld [vmem:[%s3656_s7 + $0x5d8] sm:$0xff]  ;;  %v1577_v40 = vld [vmem:[%s3656_s7 + $0x4d0] sm:$0xff] }
 0x7da   : >> { %v1216_v49 = vmax.f32 %v1211_v44, 0.0  ;;  %1481 = vmatpush.msrb.mxu1 %v1445_v42  ;;  %v1587_v41 = vld [vmem:[%s3656_s7 + $0x520] sm:$0xff]  ;;  %v1609_v42 = vld [vmem:[%s3656_s7 + $0x5d0] sm:$0xff]  ;;  %v1576_v44 = vld [vmem:[%s3656_s7 + $0x4c8] sm:$0xff] }
 0x7db   : >> { %1317 = vmatmul.f32.vlgmr.msrb.gmra.mxu3 %v1214_v46  ;;  %1521 = vmatpush.msrb.mxu0 %v1447_v34  ;;  %v1586_v34 = vld [vmem:[%s3656_s7 + $0x518] sm:$0xff]  ;;  %v1553_v46 = vld [vmem:[%s3656_s7 + $0x410] sm:$0xff] }
 0x7dc   : >> { %1357 = vmatmul.f32.vlgmr.msra.gmra.mxu2 %v1216_v49  ;;  %1499 = vmatpush.msrb.mxu3 %v1454_v47  ;;  %v1575_v47 = vld [vmem:[%s3656_s7 + $0x4c0] sm:$0xff] }
 0x7dd   : >> { %1377 = vmatmul.f32.vlgmr.msra.gmra.mxu1 %v1039_v51  ;;  %1522 = vmatpush.msrb.mxu0 %v1443_v50  ;;  %v1607_v49 = vld [vmem:[%s3656_s7 + $0x5c0] sm:$0xff]  ;;  %v1552_v50 = vld [vmem:[%s3656_s7 + $0x408] sm:$0xff]  ;;  %v1574_v51 = vld [vmem:[%s3656_s7 + $0x4b8] sm:$0xff] }
 0x7de   : >> { %1417 = vmatmul.f32.vlgmr.msra.gmra.mxu0 %v1041_v53  ;;  %1482 = vmatpush.msrb.mxu1 %v1441_v52  ;;  %v1584_v52 = vld [vmem:[%s3656_s7 + $0x508] sm:$0xff]  ;;  %v1606_v53 = vld [vmem:[%s3656_s7 + $0x5b8] sm:$0xff] }
 0x7df   : >> { %1539 = vmatpush.msra.mxu2 %v1456_v54  ;;  %1500 = vmatpush.msrb.mxu3 %v1450_v55  ;;  %v1551_v54 = vld [vmem:[%s3656_s7 + $0x400] sm:$0xff]  ;;  %v1573_v55 = vld [vmem:[%s3656_s7 + $0x4b0] sm:$0xff] }
 0x7e0   : >> { %1615 = vmatpush.msra.mxu1 %v1566_v57  ;;  %1655 = vmatpush.msra.mxu0 %v1598_v58  ;;  %v1605_v57 = vld [vmem:[%s3656_s7 + $0x5b0] sm:$0xff]  ;;  %v1572_v58 = vld [vmem:[%s3656_s7 + $0x4a8] sm:$0xff] }
 0x7e1   : >> { %1540 = vmatpush.msra.mxu2 %v1452_v60  ;;  %1501 = vmatpush.msrb.mxu3 %v1446_v61  ;;  %v1708_v60 = vld [vmem:[%s3654_s5 + $0x1e0] sm:$0xff]  ;;  %v1710_v61 = vld [vmem:[%s3654_s5 + $0x1f0] sm:$0xff] }
 0x7e2   : >> { %1616 = vmatpush.msra.mxu1 %v1565_v62  ;;  %1656 = vmatpush.msra.mxu0 %v1597_v63  ;;  %v1571_v62 = vld [vmem:[%s3656_s7 + $0x4a0] sm:$0xff] }
 0x7e3   : >> { %1397 = vmatmul.f32.vlgmr.msra.gmra.mxu3 %v1040_v6  ;;  %1541 = vmatpush.msra.mxu2 %v1448_v5  ;;  %v1603_v63 = vld [vmem:[%s3656_s7 + $0x5a0] sm:$0xff]  ;;  %v1706_v6 = vld [vmem:[%s3654_s5 + $0x170] sm:$0xff] }
 0x7e4   : >> { %1437 = vmatmul.f32.vlgmr.msrb.gmra.mxu2 %v1042_v9  ;;  %1502 = vmatpush.msrb.mxu3 %v1442_v8  ;;  %v1704_v5 = vld [vmem:[%s3654_s5 + $0x160] sm:$0xff]  ;;  %v1570_v8 = vld [vmem:[%s3656_s7 + $0x498] sm:$0xff] }
 0x7e5   : >> { %2148 = vmatmul.msk.f32.vlgmr.msrb.gmra.mxu1 %vm444_vm2, %v2669_v2  ;;  %1542 = vmatpush.msra.mxu2 %v1444_v10  ;;  %v1602_v9 = vld [vmem:[%s3656_s7 + $0x598] sm:$0xff]  ;;  %v1700_v10 = vld [vmem:[%s3654_s5 + $0xe0] sm:$0xff] }
 0x7e6   : >> { %2150 = vmatmul.msk.f32.vlgmr.msrb.gmra.mxu0 %vm444_vm2, %v2669_v2  ;;  %1617 = vmatpush.msra.mxu1 %v1564_v11  ;;  %v1702_v11 = vld [vmem:[%s3654_s5 + $0xf0] sm:$0xff] }
 0x7e7   : >> { %1657 = vmatpush.msra.mxu0 %v1596_v12  ;;  %1635 = vmatpush.msra.mxu3 %v1582_v19  ;;  %v1569_v12 = vld [vmem:[%s3656_s7 + $0x490] sm:$0xff]  ;;  %v1599_v19 = vld [vmem:[%s3656_s7 + $0x580] sm:$0xff] }
 0x7e8   : >> { %1618 = vmatpush.msra.mxu1 %v1563_v13  ;;  %1675 = vmatpush.msrb.mxu2 %v1614_v21  ;;  %v1601_v13 = vld [vmem:[%s3656_s7 + $0x590] sm:$0xff]  ;;  %v1709_v21 = vld [vmem:[%s3654_s5 + $0x1e8] sm:$0xff] }
 0x7e9   : >> { %1658 = vmatpush.msra.mxu0 %v1595_v14  ;;  %1636 = vmatpush.msra.mxu3 %v1581_v23  ;;  %v1696_v14 = vld [vmem:[%s3654_s5 + $0x60] sm:$0xff]  ;;  %v1705_v23 = vld [vmem:[%s3654_s5 + $0x168] sm:$0xff] }
 0x7ea   : >> { %1619 = vmatpush.msra.mxu1 %v1562_v15  ;;  %1676 = vmatpush.msrb.mxu2 %v1613_v25  ;;  %v1698_v15 = vld [vmem:[%s3654_s5 + $0x70] sm:$0xff]  ;;  %v1701_v25 = vld [vmem:[%s3654_s5 + $0xe8] sm:$0xff] }
 0x7eb   : >> { %2149 = vmatmul.msk.f32.vlgmr.msrb.gmra.mxu3 %vm444_vm2, %v2669_v2  ;;  %1659 = vmatpush.msra.mxu0 %v1594_v16  ;;  %v1568_v16 = vld [vmem:[%s3656_s7 + $0x488] sm:$0xff] }
 0x7ec   : >> { %2151 = vmatmul.msk.f32.vlgmr.msra.gmra.mxu2 %vm444_vm2, %v2669_v2  ;;  %1620 = vmatpush.msra.mxu1 %v1561_v7  ;;  %v1600_v7 = vld [vmem:[%s3656_s7 + $0x588] sm:$0xff] }
 0x7ed   : >> { %1660 = vmatpush.msra.mxu0 %v1593_v17  ;;  %1637 = vmatpush.msra.mxu3 %v1580_v27  ;;  %v1697_v27 = vld [vmem:[%s3654_s5 + $0x68] sm:$0xff] }
 0x7ee   : >> { %1621 = vmatpush.msra.mxu1 %v1560_v18  ;;  %1677 = vmatpush.msrb.mxu2 %v1612_v29  ;;  %v1567_v18 = vld [vmem:[%s3656_s7 + $0x480] sm:$0xff] }
 0x7ef   : >> { %1661 = vmatpush.msra.mxu0 %v1592_v20  ;;  %1638 = vmatpush.msra.mxu3 %v1579_v31  ;;  %v1457_v31 = vld [vmem:[%s3655_s6 + $0x8] sm:$0xf] }
 0x7f0   : >> { %1622 = vmatpush.msra.mxu1 %v1559_v22  ;;  %1678 = vmatpush.msrb.mxu2 %v1611_v33  ;;  %v1711_v22 = vld [vmem:[%s3654_s5 + $0x1f8] sm:$0xff] }
 0x7f1   : >> { %1662 = vmatpush.msra.mxu0 %v1591_v24  ;;  %1639 = vmatpush.msra.mxu3 %v1578_v36  ;;  %v1707_v24 = vld [vmem:[%s3654_s5 + $0x178] sm:$0xff]  ;;  %v1459_v36 = vperm.slane %v1457_v31, 0 }
 0x7f2   : >> { %1623 = vmatpush.msra.mxu1 %v1558_v26  ;;  %1679 = vmatpush.msrb.mxu2 %v1610_v38  ;;  %v1703_v26 = vld [vmem:[%s3654_s5 + $0xf8] sm:$0xff] }
 0x7f3   : >> { %1663 = vmatpush.msra.mxu0 %v1590_v28  ;;  %1640 = vmatpush.msra.mxu3 %v1577_v40  ;;  %v1699_v28 = vld [vmem:[%s3654_s5 + $0x78] sm:$0xff] }
 0x7f4   : >> { %1624 = vmatpush.msra.mxu1 %v1557_v30  ;;  %1680 = vmatpush.msrb.mxu2 %v1609_v42 }
 0x7f5   : >> { %1664 = vmatpush.msra.mxu0 %v1589_v32  ;;  %1641 = vmatpush.msra.mxu3 %v1576_v44 }
 0x7f6   : >> { %1625 = vmatpush.msra.mxu1 %v1556_v35  ;;  %1681 = vmatpush.msrb.mxu2 %v1608_v45  ;;  %v1821_v45 = vld [vmem:[%s3656_s7 + $0x678] sm:$0xff] }
 0x7f7   : >> { %1665 = vmatpush.msra.mxu0 %v1588_v37  ;;  %1642 = vmatpush.msra.mxu3 %v1575_v47  ;;  %v1461_v37 = vperm.slane %v1457_v31, 2 }
 0x7f8   : >> { %1626 = vmatpush.msra.mxu1 %v1555_v39  ;;  %1682 = vmatpush.msrb.mxu2 %v1607_v49 }
 0x7f9   : >> { %1666 = vmatpush.msra.mxu0 %v1587_v41  ;;  %1643 = vmatpush.msra.mxu3 %v1574_v51  ;;  %v1820_v51 = vld [vmem:[%s3656_s7 + $0x670] sm:$0xff] }
 0x7fa   : >> { %1627 = vmatpush.msra.mxu1 %v1554_v43  ;;  %1683 = vmatpush.msrb.mxu2 %v1606_v53 }
 0x7fb   : >> { %1667 = vmatpush.msra.mxu0 %v1586_v34  ;;  %1644 = vmatpush.msra.mxu3 %v1573_v55  ;;  %v1851_v55 = vld [vmem:[%s3656_s7 + $0x768] sm:$0xff] }
 0x7fc   : >> { %1628 = vmatpush.msra.mxu1 %v1553_v46  ;;  %1684 = vmatpush.msrb.mxu2 %v1605_v57  ;;  %v1460_v57 = vperm.slane %v1457_v31, 1 }
 0x7fd   : >> { %1668 = vmatpush.msra.mxu0 %v1585_v48  ;;  %1645 = vmatpush.msra.mxu3 %v1572_v58  ;;  %v1853_v48 = vld [vmem:[%s3656_s7 + $0x778] sm:$0xff]  ;;  %v1818_v58 = vld [vmem:[%s3656_s7 + $0x660] sm:$0xff] }
 0x7fe   : >> { %1629 = vmatpush.msra.mxu1 %v1552_v50  ;;  %1685 = vmatpush.msrb.mxu2 %v1604_v59  ;;  %v1462_v59 = vperm.slane %v1457_v31, 3  ;;  %v1834_v31 = vld [vmem:[%s3656_s7 + $0x6e0] sm:$0xff] }
 0x7ff   : >> { %1669 = vmatpush.msra.mxu0 %v1584_v52  ;;  %1646 = vmatpush.msra.mxu3 %v1571_v62  ;;  %v1852_v52 = vld [vmem:[%s3656_s7 + $0x770] sm:$0xff] }
 0x800   : >> { %1630 = vmatpush.msra.mxu1 %v1551_v54  ;;  %1686 = vmatpush.msrb.mxu2 %v1603_v63  ;;  %v1819_v54 = vld [vmem:[%s3656_s7 + $0x668] sm:$0xff]  ;;  %v1849_v63 = vld [vmem:[%s3656_s7 + $0x758] sm:$0xff] }
 0x801   : >> { %1670 = vmatpush.msra.mxu0 %v1583_v56  ;;  %1647 = vmatpush.msra.mxu3 %v1570_v8  ;;  %v1816_v8 = vld [vmem:[%s3656_s7 + $0x650] sm:$0xff] }
 0x802   : >> { %1734 = vmatpush.msrb.mxu1 %v1708_v60  ;;  %1687 = vmatpush.msrb.mxu2 %v1602_v9  ;;  %v1850_v60 = vld [vmem:[%s3656_s7 + $0x760] sm:$0xff] }
 0x803   : >> { %1774 = vmatpush.msrb.mxu0 %v1710_v61  ;;  %1648 = vmatpush.msra.mxu3 %v1569_v12  ;;  %v1817_v61 = vld [vmem:[%s3656_s7 + $0x658] sm:$0xff]  ;;  %v1815_v12 = vld [vmem:[%s3656_s7 + $0x648] sm:$0xff] }
 0x804   : >> { %1735 = vmatpush.msrb.mxu1 %v1704_v5  ;;  %1688 = vmatpush.msrb.mxu2 %v1601_v13 }
 0x805   : >> { %1775 = vmatpush.msrb.mxu0 %v1706_v6  ;;  %1649 = vmatpush.msra.mxu3 %v1568_v16  ;;  %v1846_v16 = vld [vmem:[%s3656_s7 + $0x740] sm:$0xff] }
 0x806   : >> { %1736 = vmatpush.msrb.mxu1 %v1700_v10  ;;  %1689 = vmatpush.msrb.mxu2 %v1600_v7  ;;  %v1848_v10 = vld [vmem:[%s3656_s7 + $0x750] sm:$0xff]  ;;  %v1813_v7 = vld [vmem:[%s3656_s7 + $0x638] sm:$0xff] }
 0x807   : >> { %1776 = vmatpush.msrb.mxu0 %v1702_v11  ;;  %1650 = vmatpush.msra.mxu3 %v1567_v18  ;;  %v1812_v18 = vld [vmem:[%s3656_s7 + $0x630] sm:$0xff] }
 0x808   : >> { %1737 = vmatpush.msrb.mxu1 %v1696_v14  ;;  %1690 = vmatpush.msrb.mxu2 %v1599_v19  ;;  %v1847_v14 = vld [vmem:[%s3656_s7 + $0x748] sm:$0xff]  ;;  %v1837_v19 = vld [vmem:[%s3656_s7 + $0x6f8] sm:$0xff] }
 0x809   : >> { %1777 = vmatpush.msrb.mxu0 %v1698_v15  ;;  %1754 = vmatpush.msrb.mxu3 %v1709_v21  ;;  %v1814_v15 = vld [vmem:[%s3656_s7 + $0x640] sm:$0xff]  ;;  %v1869_v21 = vld [vmem:[%s3656_s7 + $0x7f8] sm:$0xff] }
 0x80a   : >> { %1794 = vmatpush.msra.mxu2 %v1711_v22  ;;  %v1811_v22 = vld [vmem:[%s3656_s7 + $0x628] sm:$0xff] }
 0x80b   : >> { %1755 = vmatpush.msrb.mxu3 %v1705_v23  ;;  %v1836_v23 = vld [vmem:[%s3656_s7 + $0x6f0] sm:$0xff] }
 0x80c   : >> { %1795 = vmatpush.msra.mxu2 %v1707_v24  ;;  %v1843_v24 = vld [vmem:[%s3656_s7 + $0x728] sm:$0xff] }
 0x80d   : >> { %1756 = vmatpush.msrb.mxu3 %v1701_v25  ;;  %v1868_v25 = vld [vmem:[%s3656_s7 + $0x7f0] sm:$0xff] }
 0x80e   : >> { %1796 = vmatpush.msra.mxu2 %v1703_v26  ;;  %v1810_v26 = vld [vmem:[%s3656_s7 + $0x620] sm:$0xff] }
 0x80f   : >> { %1757 = vmatpush.msrb.mxu3 %v1697_v27  ;;  %v1835_v27 = vld [vmem:[%s3656_s7 + $0x6e8] sm:$0xff] }
 0x810   : >> { %1797 = vmatpush.msra.mxu2 %v1699_v28  ;;  %v1842_v28 = vld [vmem:[%s3656_s7 + $0x720] sm:$0xff] }
 0x852   : >> { %v1298_v17 = vpop.f32.mrf.mxu1 }
 0x853   : >> { %v1338_v20 = vpop.f32.mrf.mxu0 }
 0x85a   : >> { %v1378_v29 = vpop.f32.mrf.mxu1 }
 0x85b   : >> { %v1418_v30 = vpop.f32.mrf.mxu0 }
 0x85e   : >> { %v1318_v32 = vpop.f32.mrf.mxu3 }
 0x85f   : >> { %v1319_v33 = vadd.f32 %v1318_v32, %v1298_v17  ;;  %v1358_v35 = vpop.f32.mrf.mxu2  ;;  %v1845_v17 = vld [vmem:[%s3656_s7 + $0x738] sm:$0xff] }
 0x860   : >> { %v1841_v32 = vld [vmem:[%s3656_s7 + $0x718] sm:$0xff] }
 0x861   : >> { %v1339_v38 = vadd.f32 %v1338_v20, %v1319_v33  ;;  %v1844_v20 = vld [vmem:[%s3656_s7 + $0x730] sm:$0xff]  ;;  %v1866_v33 = vld [vmem:[%s3656_s7 + $0x7e0] sm:$0xff] }
 0x862   : >> { %v1484_v39 = vpop.f32.mrf.mxu1 }
 0x863   : >> { %v1359_v40 = vadd.f32 %v1358_v35, %v1339_v38  ;;  %v1485_v41 = vadd.f32 %v1484_v39, %v1459_v36  ;;  %v1524_v42 = vpop.f32.mrf.mxu0  ;;  %v1808_v35 = vld [vmem:[%s3656_s7 + $0x610] sm:$0xff]  ;;  %v1833_v36 = vld [vmem:[%s3656_s7 + $0x6d8] sm:$0xff]  ;;  %v1807_v39 = vld [vmem:[%s3656_s7 + $0x608] sm:$0xff] }
 0x864   : >> { %v1525_v43 = vadd.f32 %v1524_v42, %v1461_v37  ;;  %v1840_v37 = vld [vmem:[%s3656_s7 + $0x710] sm:$0xff]  ;;  %v1865_v38 = vld [vmem:[%s3656_s7 + $0x7d8] sm:$0xff] }
 0x865   : >> { %v1547_v44 = vmax.f32 %v1485_v41, 0.0  ;;  %v1379_v34 = vadd.f32 %v1378_v29, %v1359_v40  ;;  %v1867_v29 = vld [vmem:[%s3656_s7 + $0x7e8] sm:$0xff]  ;;  %v1832_v40 = vld [vmem:[%s3656_s7 + $0x6d0] sm:$0xff] }
 0x866   : >> { %v1549_v46 = vmax.f32 %v1525_v43, 0.0  ;;  %v1398_v47 = vpop.f32.mrf.mxu3  ;;  %v1839_v41 = vld [vmem:[%s3656_s7 + $0x708] sm:$0xff]  ;;  %v1864_v42 = vld [vmem:[%s3656_s7 + $0x7d0] sm:$0xff]  ;;  %v1806_v43 = vld [vmem:[%s3656_s7 + $0x600] sm:$0xff] }
 0x867   : >> { %v1399_v49 = vadd.f32 %v1398_v47, %v1379_v34  ;;  %v1438_v50 = vpop.f32.mrf.mxu2  ;;  %1631 = vmatmul.f32.vlgmr.msra.gmra.mxu1 %v1547_v44  ;;  %v1831_v44 = vld [vmem:[%s3656_s7 + $0x6c8] sm:$0xff]  ;;  %v1838_v34 = vld [vmem:[%s3656_s7 + $0x700] sm:$0xff] }
 0x868   : >> { %1671 = vmatmul.f32.vlgmr.msra.gmra.mxu0 %v1549_v46  ;;  %1870 = vmatpush.msra.mxu1 %v1821_v45  ;;  %v1863_v45 = vld [vmem:[%s3656_s7 + $0x7c8] sm:$0xff]  ;;  %v1830_v46 = vld [vmem:[%s3656_s7 + $0x6c0] sm:$0xff] }
 0x869   : >> { %v1419_v53 = vadd.f32 %v1418_v30, %v1399_v49  ;;  %1910 = vmatpush.msra.mxu0 %v1853_v48  ;;  %v1809_v30 = vld [vmem:[%s3656_s7 + $0x618] sm:$0xff]  ;;  %v1862_v47 = vld [vmem:[%s3656_s7 + $0x7c0] sm:$0xff] }
 0x86a   : >> { %1871 = vmatpush.msra.mxu1 %v1820_v51  ;;  %v1829_v48 = vld [vmem:[%s3656_s7 + $0x6b8] sm:$0xff]  ;;  %v1860_v51 = vld [vmem:[%s3656_s7 + $0x7b0] sm:$0xff] }
 0x86b   : >> { %v3394_v56 = vadd.f32 %v1438_v50, %v1419_v53  ;;  %1911 = vmatpush.msra.mxu0 %v1852_v52  ;;  %v1861_v49 = vld [vmem:[%s3656_s7 + $0x7b8] sm:$0xff]  ;;  %v1828_v50 = vld [vmem:[%s3656_s7 + $0x6b0] sm:$0xff]  ;;  %v1827_v52 = vld [vmem:[%s3656_s7 + $0x6a8] sm:$0xff] }
 0x86c   : >> { %1872 = vmatpush.msra.mxu1 %v1819_v54  ;;  %v1859_v53 = vld [vmem:[%s3656_s7 + $0x7a8] sm:$0xff]  ;;  %v1826_v54 = vld [vmem:[%s3656_s7 + $0x6a0] sm:$0xff] }
 0x86d   : >> { %1912 = vmatpush.msra.mxu0 %v1851_v55  ;;  %v1858_v55 = vld [vmem:[%s3656_s7 + $0x7a0] sm:$0xff] }
 0x86e   : >> { %v1504_v62 = vpop.f32.mrf.mxu3  ;;  %1873 = vmatpush.msra.mxu1 %v1818_v58  ;;  %v1857_v58 = vld [vmem:[%s3656_s7 + $0x798] sm:$0xff] }
 0x86f   : >> { %v1505_v5 = vadd.f32 %v1504_v62, %v1460_v57  ;;  %v1544_v6 = vpop.f32.mrf.mxu2  ;;  %2152 = vmatmul.msk.f32.vlgmr.msrb.gmra.mxu1 %vm444_vm2, %v2669_v2  ;;  %1913 = vmatpush.msra.mxu0 %v1850_v60  ;;  %v1825_v57 = vld [vmem:[%s3656_s7 + $0x698] sm:$0xff]  ;;  %v1856_v60 = vld [vmem:[%s3656_s7 + $0x790] sm:$0xff]  ;;  %v1855_v62 = vld [vmem:[%s3656_s7 + $0x788] sm:$0xff] }
 0x870   : >> { %v1545_v9 = vadd.f32 %v1544_v6, %v1462_v59  ;;  %2154 = vmatmul.msk.f32.vlgmr.msrb.gmra.mxu0 %vm444_vm2, %v2669_v2  ;;  %1874 = vmatpush.msra.mxu1 %v1817_v61  ;;  %v1824_v59 = vld [vmem:[%s3656_s7 + $0x690] sm:$0xff]  ;;  %v1823_v61 = vld [vmem:[%s3656_s7 + $0x688] sm:$0xff] }
 0x871   : >> { %v1548_v11 = vmax.f32 %v1505_v5, 0.0  ;;  %1914 = vmatpush.msra.mxu0 %v1849_v63  ;;  %v1822_v63 = vld [vmem:[%s3656_s7 + $0x680] sm:$0xff] }
 0x872   : >> { %v1550_v13 = vmax.f32 %v1545_v9, 0.0  ;;  %1875 = vmatpush.msra.mxu1 %v1816_v8  ;;  %v1854_v5 = vld [vmem:[%s3656_s7 + $0x780] sm:$0xff]  ;;  %v1712_v9 = vld [vmem:[%s3655_s6 + $0xc] sm:$0xf] }
 0x873   : >> { %1651 = vmatmul.f32.vlgmr.msra.gmra.mxu3 %v1548_v11  ;;  %1915 = vmatpush.msra.mxu0 %v1848_v10  ;;  %v1714_v10 = vperm.slane %v1712_v9, 0  ;;  %v1716_v11 = vperm.slane %v1712_v9, 2 }
 0x874   : >> { %1691 = vmatmul.f32.vlgmr.msrb.gmra.mxu2 %v1550_v13  ;;  %1876 = vmatpush.msra.mxu1 %v1815_v12 }
 0x875   : >> { %1916 = vmatpush.msra.mxu0 %v1847_v14  ;;  %1890 = vmatpush.msra.mxu3 %v1837_v19 }
 0x876   : >> { %1877 = vmatpush.msra.mxu1 %v1814_v15  ;;  %1930 = vmatpush.msrb.mxu2 %v1869_v21 }
 0x877   : >> { %1917 = vmatpush.msra.mxu0 %v1846_v16  ;;  %1891 = vmatpush.msra.mxu3 %v1836_v23  ;;  %v1717_v23 = vperm.slane %v1712_v9, 3 }
 0x878   : >> { %1878 = vmatpush.msra.mxu1 %v1813_v7  ;;  %1931 = vmatpush.msrb.mxu2 %v1868_v25 }
 0x879   : >> { %1918 = vmatpush.msra.mxu0 %v1845_v17  ;;  %1892 = vmatpush.msra.mxu3 %v1835_v27 }
 0x87a   : >> { %1879 = vmatpush.msra.mxu1 %v1812_v18  ;;  %1932 = vmatpush.msrb.mxu2 %v1867_v29 }
 0x87b   : >> { %2153 = vmatmul.msk.f32.vlgmr.msrb.gmra.mxu3 %vm444_vm2, %v2669_v2  ;;  %1919 = vmatpush.msra.mxu0 %v1844_v20 }
 0x87c   : >> { %2155 = vmatmul.msk.f32.vlgmr.msra.gmra.mxu2 %vm444_vm2, %v2669_v2  ;;  %1880 = vmatpush.msra.mxu1 %v1811_v22  ;;  %v1715_v22 = vperm.slane %v1712_v9, 1 }
 0x87d   : >> { %1920 = vmatpush.msra.mxu0 %v1843_v24  ;;  %1893 = vmatpush.msra.mxu3 %v1834_v31 }
 0x87e   : >> { %1881 = vmatpush.msra.mxu1 %v1810_v26  ;;  %1933 = vmatpush.msrb.mxu2 %v1866_v33 }
 0x87f   : >> { %1921 = vmatpush.msra.mxu0 %v1842_v28  ;;  %1894 = vmatpush.msra.mxu3 %v1833_v36 }
 0x880   : >> { %1882 = vmatpush.msra.mxu1 %v1809_v30  ;;  %1934 = vmatpush.msrb.mxu2 %v1865_v38 }
 0x881   : >> { %1922 = vmatpush.msra.mxu0 %v1841_v32  ;;  %1895 = vmatpush.msra.mxu3 %v1832_v40 }
 0x882   : >> { %1883 = vmatpush.msra.mxu1 %v1808_v35  ;;  %1935 = vmatpush.msrb.mxu2 %v1864_v42 }
 0x883   : >> { %1923 = vmatpush.msra.mxu0 %v1840_v37  ;;  %1896 = vmatpush.msra.mxu3 %v1831_v44 }
 0x884   : >> { %1884 = vmatpush.msra.mxu1 %v1807_v39  ;;  %1936 = vmatpush.msrb.mxu2 %v1863_v45  ;;  %v1951_v39 = vperm.slane %v2482_v4, 7 }
 0x885   : >> { %1924 = vmatpush.msra.mxu0 %v1839_v41  ;;  %1897 = vmatpush.msra.mxu3 %v1830_v46 }
 0x886   : >> { %1885 = vmatpush.msra.mxu1 %v1806_v43  ;;  %1937 = vmatpush.msrb.mxu2 %v1862_v47 }
 0x887   : >> { %1925 = vmatpush.msra.mxu0 %v1838_v34  ;;  %1898 = vmatpush.msra.mxu3 %v1829_v48 }
 0x888   : >> { %1938 = vmatpush.msrb.mxu2 %v1861_v49 }
 0x889   : >> { %1899 = vmatpush.msra.mxu3 %v1828_v50 }
 0x88a   : >> { %1939 = vmatpush.msrb.mxu2 %v1860_v51 }
 0x88b   : >> { %1900 = vmatpush.msra.mxu3 %v1827_v52 }
 0x88c   : >> { %1940 = vmatpush.msrb.mxu2 %v1859_v53 }
 0x88d   : >> { %1901 = vmatpush.msra.mxu3 %v1826_v54 }
 0x88e   : >> { %1941 = vmatpush.msrb.mxu2 %v1858_v55  ;;  %v1976_v55 = vperm.slane %v2460_v0, 0 }
 0x88f   : >> { %1902 = vmatpush.msra.mxu3 %v1825_v57 }
 0x890   : >> { %1942 = vmatpush.msrb.mxu2 %v1857_v58  ;;  %v1978_v58 = vperm.slane %v2460_v0, 1  ;;  %v1986_v0 = vld [vmem:[%s3657_s8] sm:$0xff] (%p435_p11) }
 0x891   : >> { %1903 = vmatpush.msra.mxu3 %v1824_v59 }
 0x892   : >> { %1943 = vmatpush.msrb.mxu2 %v1856_v60 }
 0x893   : >> { %1904 = vmatpush.msra.mxu3 %v1823_v61 }
 0x894   : >> { %1944 = vmatpush.msrb.mxu2 %v1855_v62  ;;  %v1988_v62 = vld [vmem:[%s3657_s8 + $0x10] sm:$0xff] (%p435_p11) }
 0x895   : >> { %1905 = vmatpush.msra.mxu3 %v1822_v63  ;;  %v2347_v63 = vmov (%p435_p11), 0  }
 0x896   : >> { %1945 = vmatpush.msrb.mxu2 %v1854_v5  ;;  %2252 = vset.pattern.permute.xlu0 (%p435_p11), %v2347_v63  ;;  %v1987_v5 = vld [vmem:[%s3657_s8 + $0x8] sm:$0xff] (%p435_p11) }
 0x8e4   : >> { %v1632_v6 = vpop.f32.mrf.mxu1 }
 0x8e5   : >> { %v1672_v8 = vpop.f32.mrf.mxu0 }
 0x8ec   : >> { %v1739_v12 = vpop.f32.mrf.mxu1 }
 0x8ed   : >> { %v1740_v13 = vadd.f32 %v1739_v12, %v1714_v10  ;;  %v1779_v14 = vpop.f32.mrf.mxu0 }
 0x8ee   : >> { %v1780_v15 = vadd.f32 %v1779_v14, %v1716_v11 }
 0x8ef   : >> { %v1802_v16 = vmax.f32 %v1740_v13, 0.0 }
 0x8f0   : >> { %v1804_v7 = vmax.f32 %v1780_v15, 0.0 }
 0x8f1   : >> { %1886 = vmatmul.f32.vlgmr.msra.gmra.mxu1 %v1802_v16 }
 0x8f2   : >> { %1926 = vmatmul.f32.vlgmr.msra.gmra.mxu0 %v1804_v7 }
 0x8f6   : >> { %v1652_v17 = vpop.f32.mrf.mxu3 }
 0x8f7   : >> { %v1653_v18 = vadd.f32 %v1652_v17, %v1632_v6  ;;  %v1692_v19 = vpop.f32.mrf.mxu2 }
 0x8f9   : >> { %v1673_v20 = vadd.f32 %v1672_v8, %v1653_v18 }
 0x8fb   : >> { %v1693_v21 = vadd.f32 %v1692_v19, %v1673_v20 }
 0x8fd   : >> { %v1695_v24 = vadd.f32 %v1693_v21, %v3394_v56 }
 0x8fe   : >> { %v1759_v25 = vpop.f32.mrf.mxu3 }
 0x8ff   : >> { %v1760_v26 = vadd.f32 %v1759_v25, %v1715_v22  ;;  %v1799_v27 = vpop.f32.mrf.mxu2 }
 0x900   : >> { %v1800_v28 = vadd.f32 %v1799_v27, %v1717_v23 }
 0x901   : >> { %v1803_v29 = vmax.f32 %v1760_v26, 0.0 }
 0x902   : >> { %v1805_v30 = vmax.f32 %v1800_v28, 0.0 }
 0x903   : >> { %1906 = vmatmul.f32.vlgmr.msra.gmra.mxu3 %v1803_v29 }
 0x904   : >> { %1946 = vmatmul.f32.vlgmr.msrb.gmra.mxu2 %v1805_v30 }
 0x96e   : >> { %v1887_v31 = vpop.f32.mrf.mxu1 }
 0x96f   : >> { %v1927_v35 = vpop.f32.mrf.mxu0 }
 0x986   : >> { %v1907_v32 = vpop.f32.mrf.mxu3 }
 0x987   : >> { %v1908_v33 = vadd.f32 %v1907_v32, %v1887_v31  ;;  %v1947_v37 = vpop.f32.mrf.mxu2 }
 0x989   : >> { %v1928_v36 = vadd.f32 %v1927_v35, %v1908_v33 }
 0x98b   : >> { %v1948_v38 = vadd.f32 %v1947_v37, %v1928_v36 }
 0x98d   : >> { %v1950_v40 = vadd.f32 %v1948_v38, %v1695_v24 }
 0x98f   : >> { %v1952_v41 = vadd.f32 %v1951_v39, %v1950_v40 }
 0x991   : >> { %v1953_v56 = vadd.f32 %v1952_v41, %v2669_v2 }
 0x993   : >> { %v1954_v42 = vsel %vm444_vm2, %v1953_v56, 0.0 }
 0x994   : >> { %1955 = vadd.xlane.f32.xlu2 %v1954_v42 }
 0xa07   : >> { %v1956_v43 = vpop.xlane.xlu2 %1955 }
 0xa08   : >> { %v1957_v44 = vmul.f32 %v1956_v43, %v2561_v1 }
 0xa0a   : >> { %v1958_v34 = vsub.f32 %v1953_v56, %v1957_v44 }
 0xa0c   : >> { %v1959_v45 = vmul.f32 %v1958_v34, %v1958_v34 }
 0xa0e   : >> { %v1960_v46 = vsel %vm444_vm2, %v1959_v45, 0.0 }
 0xa0f   : >> { %1961 = vadd.xlane.f32.xlu0 %v1960_v46 }
 0xa23   : > { %1982 = vperm.xlu0 (%p435_p11), %2252, %v2477_v3   ;;  %v2253_v3 = vld [vmem:[%s3658_s9] ss:$0 sm:$0xff] (%p435_p11) }
 0xa82   : >> { %v1962_v47 = vpop.xlane.xlu0 %1961 }
 0xa83   : >> { %v1963_v48 = vmul.f32 %v1962_v47, %v2561_v1  ;;  %v1989_v1 = vld [vmem:[%s3657_s8 + $0x18] sm:$0xff] (%p435_p11) }
 0xa84   : > { %2010 = vmatpush.msra.mxu0 (%p435_p11), %v1989_v1 }
 0xa85   : >> { %v1964_v49 = vadd.f32 1e-05, %v1963_v48 }
 0xa86   : > { %2011 = vmatpush.msra.mxu0 (%p435_p11), %v1988_v62 }
 0xa87   : >> { %2250 = vrsqrt.f32 %v1964_v49  ;;  %vm1971_vm10 = vweird.f32 %v1964_v49 }
 0xa88   : > { %2012 = vmatpush.msra.mxu0 (%p435_p11), %v1987_v5 }
 0xa8a   : > { %2013 = vmatpush.msra.mxu0 (%p435_p11), %v1986_v0 }
 0xa8d   : >> { %v2251_v50 = vpop.eup %2250 }
 0xa8e   : >> { %v1966_v51 = vmul.f32 %v2251_v50, %v1964_v49  ;;  %vm1972_vm9 = vweird.f32 %v2251_v50 }
 0xa8f   : >> { %vm1973_vm11 = vmor %vm1971_vm10, %vm1972_vm9 }
 0xa90   : >> { %v1967_v52 = vmul.f32 %v2251_v50, %v1966_v51 }
 0xa92   : >> { %v1968_v2 = vmul.f32 0.5, %v1967_v52 }
 0xa94   : >> { %v1969_v53 = vsub.f32 1.5, %v1968_v2 }
 0xa95   : > { %v1983_v4 = vpop.permute.xlu0 (%p435_p11), %1982 }
 0xa96   : >> { %v1970_v54 = vmul.f32 %v2251_v50, %v1969_v53 }
 0xa98   : >> { %v1974_v57 = vsel %vm1973_vm11, %v2251_v50, %v1970_v54 }
 0xa99   : >> { %v1975_v59 = vmul.f32 %v1974_v57, %v1958_v34 }
 0xa9b   : >> { %v1977_v60 = vmul.f32 %v1976_v55, %v1975_v59  ;;  %437 = sbr.rel (!%p435_p11) target bundleno = 155 (0x9b), region = 109 }
 0xa9d   : >> { %v1979_v61 = vadd.f32 %v1978_v58, %v1977_v60  }
 0xa9f   : >> { %v3671_v7 = vmov %v1979_v61  ;;  %v1985_v6 = vmul.f32 (%p435_p11), %v1983_v4, %v1979_v61 }
 0xaa1   : > { %2156 = vmatmul.msk.f32.vlgmr.msra.gmra.mxu0 %vm444_vm2, %v1985_v6 }
 0xb1e   : > { %v2015_v8 = vpop.f32.mrf.mxu0 }
 0xb1f   : > { %v2016_v9 = vadd.f32 %v2253_v3, %v2015_v8 }
 0xb21   : > { %2018 = vst [vmem:[%s3673_s0] sm:$0xff] %v2016_v9 }
 0xb22   : > { %2281 = shalt.err (!%p2278_p4)
}
 0xb23   : > { %2161 = dma.vmem_to_hbm [thread:$0]  (%p2446_p5), %s2033_s14, 128, %s2035_s16, %s2020_s19  }
 0xb24 PF: > { %p2167_p7 = scmp.ge.s32.totalorder %s2324_s20, 2  ;;  %s2046_s15 = sand.u32 1, %s2312_s17  }
 0xb25   : > { %s2047_s12 = scalar_lea.sflag [#allocation3], %s2046_s15 }
 0xb26   : > { %p2164_p8 = pnand %p2167_p7, %p2450_p6 }
 0xb28   : > { %p2165_p9 = pneg %p2164_p8 }
 0xb2a   : > { %2307 = dma.done.wait (%p2165_p9), %s2047_s12, 128  }
 0xb2b   : > { %2309 = vsyncadd (%p2165_p9), %s2047_s12, 4294967168  ;;  %s3675_s1 = sld [smem:[#allocation5_spill]]  ;;  %p21_p10 = scmp.ge.s32.totalorder %s2433_s23, 4  }
 0xb2c   : > { %s3676_s19 = sld [smem:[#allocation6_spill]]  ;;  %s3677_s17 = smov %s2316_s18 }
 0xb2d   : > { %s3679_s20 = smov %s2433_s23  ;;  %23 = sbr.rel (!%p21_p10) target bundleno = 6 (0x6), region = 120 }
 0xb31   : > { %s3678_s18 = smov %s3675_s1 }
 0xb32   :  { %2053 = vsyncpa [#allocation3], 1 }
 0xb33   :  { %2055 = vsyncpa [#allocation3 + $0x1], 1 }

</bundles_post_ra>
